<compile_context>
chip_gen: v5e
topology: v5e:2x2
jax: 0.10.0
libtpu: 0.0.40
codegen_flags: <defaults>
</compile_context>

<pallas_src>
import functools

import jax
import jax.numpy as jnp
from jax.experimental import pallas as pl
from jax.experimental.pallas import tpu as pltpu

LRELU_SLOPE = 0.2          # nn.LeakyReLU(0.2)
IN_EPS = 1e-5              # nn.InstanceNorm2d default eps

VMEM_LIMIT_BYTES = 48 * 1024 * 1024   # headroom vs. 64 MiB physical VMEM on v7x
_VMEM_TILE_BUDGET = 24 * 1024 * 1024  # rough per-step working-set target for tile selection


def _round_up(x, m):
    return (x + m - 1) // m * m


# ----------------------------------------------------------------------------- generic GEMM kernel

def _gemm_bias_kernel(x_ref, w_ref, b_ref, o_ref, acc_ref, *, apply_lrelu):
    # x: (tm, tk) bf16   w: (tk, n_pad) bf16   b: (1, n_pad) f32   o/acc: (tm, n_pad) f32
    kk = pl.program_id(1)

    @pl.when(kk == 0)
    def _():
        acc_ref[...] = jnp.zeros_like(acc_ref)

    acc_ref[...] += jnp.dot(x_ref[...], w_ref[...], preferred_element_type=jnp.float32)

    @pl.when(kk == pl.num_programs(1) - 1)
    def _():
        acc = acc_ref[...] + b_ref[...]
        if apply_lrelu:
            acc = jnp.where(acc > 0, acc, LRELU_SLOPE * acc)
        o_ref[...] = acc.astype(o_ref.dtype)


def _pick_tiles(m, k, n_pad):
    """Choose (tm, tk) for the (M, K) grid of the GEMM under a VMEM budget."""
    tk = min(_round_up(k, 128), 512)
    m8 = _round_up(m, 8)
    if m8 <= 128:
        return m8, tk
    tm = 128
    for cand in (1024, 512, 256):
        # bf16 inputs double-buffered + f32 output double-buffered + f32 accumulator
        est = 2 * cand * tk * 2 + 2 * tk * n_pad * 2 + 3 * cand * n_pad * 4
        if est <= _VMEM_TILE_BUDGET and m8 >= 2 * cand:   # keep >=2 M-steps (megacore)
            tm = cand
            break
    return tm, tk


def matmul_bias(x, w, b, *, apply_lrelu=False):
    """out = [lrelu](x @ w + b). bf16 MXU operands, f32 accumulate, lane-dense padded output."""
    m, k = x.shape
    k2, n = w.shape
    assert k == k2, (k, k2)

    n_pad = max(_round_up(n, 128), 128)
    tm, tk = _pick_tiles(m, k, n_pad)
    m_pad = _round_up(m, tm)
    k_pad = _round_up(k, tk)

    xp = jnp.pad(x, ((0, m_pad - m), (0, k_pad - k))).astype(jnp.bfloat16)
    wp = jnp.pad(w, ((0, k_pad - k), (0, n_pad - n))).astype(jnp.bfloat16)
    bp = jnp.pad(b.astype(jnp.float32), (0, n_pad - n)).reshape(1, n_pad)

    kernel = functools.partial(_gemm_bias_kernel, apply_lrelu=apply_lrelu)
    out = pl.pallas_call(
        kernel,
        out_shape=jax.ShapeDtypeStruct((m_pad, n_pad), jnp.float32),
        grid=(m_pad // tm, k_pad // tk),
        in_specs=[
            pl.BlockSpec((tm, tk), lambda i, kk: (i, kk)),
            pl.BlockSpec((tk, n_pad), lambda i, kk: (kk, 0)),
            pl.BlockSpec((1, n_pad), lambda i, kk: (0, 0)),
        ],
        out_specs=pl.BlockSpec((tm, n_pad), lambda i, kk: (i, 0)),
        scratch_shapes=[pltpu.VMEM((tm, n_pad), jnp.float32)],
        compiler_params=pltpu.CompilerParams(
            dimension_semantics=("parallel", "arbitrary"),
            vmem_limit_bytes=VMEM_LIMIT_BYTES),
    )(xp, wp, bp)
    return out[:m, :n]


# ----------------------------------------------------------------------------- fused conv + IN + LReLU

def _in_lrelu_epilogue(y):
    # y: (HW, Cpad) f32 -- per-instance InstanceNorm (biased var, no affine) + LeakyReLU(0.2)
    mean = jnp.mean(y, axis=0, keepdims=True)
    var = jnp.mean((y - mean) ** 2, axis=0, keepdims=True)
    y = (y - mean) * jax.lax.rsqrt(var + IN_EPS)
    return jnp.where(y > 0, y, LRELU_SLOPE * y)


def _conv_in_lrelu_kernel(cols_ref, w_ref, b_ref, o_ref, acc_ref):
    # cols: (1, HW, tk) bf16   w: (tk, Cpad) bf16   b: (1, Cpad) f32   o: (1, HW, Cpad) f32
    kk = pl.program_id(1)

    @pl.when(kk == 0)
    def _():
        acc_ref[...] = jnp.zeros_like(acc_ref)

    acc_ref[...] += jnp.dot(cols_ref[0], w_ref[...], preferred_element_type=jnp.float32)

    @pl.when(kk == pl.num_programs(1) - 1)
    def _():
        y = _in_lrelu_epilogue(acc_ref[...] + b_ref[...])
        o_ref[...] = y[None].astype(o_ref.dtype)


def _conv_in_lrelu_final_kernel(cols_ref, w_ref, b_ref, wf_ref, bf_ref, o_ref, acc_ref):
    # Same as above, plus the fused trailing 1x1 conv (PatchGAN head) on the VMEM-resident result.
    kk = pl.program_id(1)

    @pl.when(kk == 0)
    def _():
        acc_ref[...] = jnp.zeros_like(acc_ref)

    acc_ref[...] += jnp.dot(cols_ref[0], w_ref[...], preferred_element_type=jnp.float32)

    @pl.when(kk == pl.num_programs(1) - 1)
    def _():
        y = _in_lrelu_epilogue(acc_ref[...] + b_ref[...])
        out = jnp.dot(y, wf_ref[...], preferred_element_type=jnp.float32) + bf_ref[...]
        o_ref[...] = out[None].astype(o_ref.dtype)


def conv_in_lrelu(x_nhwc, weight, bias, *, stride, pad, final_w=None, final_b=None):
    """Conv2d(reflect pad) -> InstanceNorm2d -> LeakyReLU(0.2), fused into one Pallas call
    (grid over batch instances, K tiled with an f32 accumulator). If final_w/final_b are
    given, the trailing 1x1 conv is applied in the same epilogue (its input never hits HBM)."""
    cout, cin, kh, kw = weight.shape
    xp = _reflect_pad(x_nhwc, pad)
    cols, (n, ho, wo) = _im2col(xp, kh, kw, stride)
    hw, k = ho * wo, kh * kw * cin

    c_pad = max(_round_up(cout, 128), 128)
    tk = min(_round_up(k, 128), 512)
    k_pad = _round_up(k, tk)

    cols3 = jnp.pad(cols.reshape(n, hw, k),
                    ((0, 0), (0, 0), (0, k_pad - k))).astype(jnp.bfloat16)
    w2 = jnp.transpose(weight, (2, 3, 1, 0)).reshape(k, cout)
    w2 = jnp.pad(w2, ((0, k_pad - k), (0, c_pad - cout))).astype(jnp.bfloat16)
    b2 = jnp.pad(bias.astype(jnp.float32), (0, c_pad - cout)).reshape(1, c_pad)

    grid = (n, k_pad // tk)
    cparams = pltpu.CompilerParams(dimension_semantics=("parallel", "arbitrary"),
                                   vmem_limit_bytes=VMEM_LIMIT_BYTES)

    if final_w is None:
        out = pl.pallas_call(
            _conv_in_lrelu_kernel,
            out_shape=jax.ShapeDtypeStruct((n, hw, c_pad), jnp.float32),
            grid=grid,
            in_specs=[
                pl.BlockSpec((1, hw, tk), lambda b, kk: (b, 0, kk)),
                pl.BlockSpec((tk, c_pad), lambda b, kk: (kk, 0)),
                pl.BlockSpec((1, c_pad), lambda b, kk: (0, 0)),
            ],
            out_specs=pl.BlockSpec((1, hw, c_pad), lambda b, kk: (b, 0, 0)),
            scratch_shapes=[pltpu.VMEM((hw, c_pad), jnp.float32)],
            compiler_params=cparams,
        )(cols3, w2, b2)
        return out[:, :, :cout].reshape(n, ho, wo, cout)

    # fused final 1x1 conv: Cout_final = 1, padded to a lane-dense 128-wide output (col 0 real)
    cf = final_w.shape[0]
    f_pad = max(_round_up(cf, 128), 128)
    wf = final_w.reshape(cf, cout).T                                   # (cout, cf)
    wf = jnp.pad(wf, ((0, c_pad - cout), (0, f_pad - cf))).astype(jnp.float32)
    bf = jnp.pad(final_b.astype(jnp.float32), (0, f_pad - cf)).reshape(1, f_pad)

    out = pl.pallas_call(
        _conv_in_lrelu_final_kernel,
        out_shape=jax.ShapeDtypeStruct((n, hw, f_pad), jnp.float32),
        grid=grid,
        in_specs=[
            pl.BlockSpec((1, hw, tk), lambda b, kk: (b, 0, kk)),
            pl.BlockSpec((tk, c_pad), lambda b, kk: (kk, 0)),
            pl.BlockSpec((1, c_pad), lambda b, kk: (0, 0)),
            pl.BlockSpec((c_pad, f_pad), lambda b, kk: (0, 0)),
            pl.BlockSpec((1, f_pad), lambda b, kk: (0, 0)),
        ],
        out_specs=pl.BlockSpec((1, hw, f_pad), lambda b, kk: (b, 0, 0)),
        scratch_shapes=[pltpu.VMEM((hw, c_pad), jnp.float32)],
        compiler_params=cparams,
    )(cols3, w2, b2, wf, bf)
    return out[:, :, :cf].reshape(n, ho, wo, cf)


# ----------------------------------------------------------------------------- JAX glue

def _reflect_pad(x_nhwc, pad):
    if pad == 0:
        return x_nhwc
    return jnp.pad(x_nhwc, ((0, 0), (pad, pad), (pad, pad), (0, 0)), mode="reflect")


def _im2col(x_nhwc, kh, kw, stride):
    n, h, w, c = x_nhwc.shape
    ho = (h - kh) // stride + 1
    wo = (w - kw) // stride + 1
    cols = []
    for i in range(kh):
        for j in range(kw):
            cols.append(x_nhwc[:, i:i + stride * ho:stride, j:j + stride * wo:stride, :])
    p = jnp.stack(cols, axis=3)                      # (n, ho, wo, kh*kw, c)
    return p.reshape(n * ho * wo, kh * kw * c), (n, ho, wo)


def conv2d(x_nhwc, weight, bias, *, stride=1, pad=0, apply_lrelu=False):
    """Conv2d with reflect padding via im2col + Pallas GEMM. weight is PyTorch (Cout,Cin,kh,kw)."""
    cout, cin, kh, kw = weight.shape
    xp = _reflect_pad(x_nhwc, pad)
    cols, (n, ho, wo) = _im2col(xp, kh, kw, stride)
    w2 = jnp.transpose(weight, (2, 3, 1, 0)).reshape(kh * kw * cin, cout)
    y = matmul_bias(cols, w2, bias, apply_lrelu=apply_lrelu)
    return y.reshape(n, ho, wo, cout)


# ----------------------------------------------------------------------------- model

def init_discriminator_params(key, input_channel, hidden_channel):
    def conv_params(k, cout, cin, kh, kw):
        k1, k2 = jax.random.split(k)
        fan_in = cin * kh * kw
        w = jax.random.normal(k1, (cout, cin, kh, kw), jnp.float32) / jnp.sqrt(float(fan_in))
        b = jax.random.normal(k2, (cout,), jnp.float32) * 0.01
        return w, b

    keys = jax.random.split(key, 5)
    h = hidden_channel
    return {
        "upfeature": conv_params(keys[0], h, input_channel, 7, 7),
        "contract1": conv_params(keys[1], 2 * h, h, 4, 4),
        "contract2": conv_params(keys[2], 4 * h, 2 * h, 4, 4),
        "contract3": conv_params(keys[3], 8 * h, 4 * h, 4, 4),
        "final": conv_params(keys[4], 1, 8 * h, 1, 1),
    }


def discriminator_forward(params, x_nchw):
    x = jnp.transpose(x_nchw, (0, 2, 3, 1))                        # NCHW -> NHWC

    w, b = params["upfeature"]
    x0 = conv2d(x, w, b, stride=1, pad=3, apply_lrelu=False)       # FeatureMapBlock

    w, b = params["contract1"]
    x1 = conv2d(x0, w, b, stride=2, pad=1, apply_lrelu=True)       # no InstanceNorm

    w, b = params["contract2"]
    x2 = conv_in_lrelu(x1, w, b, stride=2, pad=1)                  # fused conv+IN+LReLU

    w, b = params["contract3"]
    wf, bf = params["final"]
    xn = conv_in_lrelu(x2, w, b, stride=2, pad=1,                  # fused conv+IN+LReLU+final 1x1
                       final_w=wf, final_b=bf)

    return jnp.transpose(xn, (0, 3, 1, 2))                         # NHWC -> NCHW


if __name__ == "__main__":
    key = jax.random.PRNGKey(0)
    k_params, k_x = jax.random.split(key)

    input_channel, hidden_channel = 3, 8     # small hidden for a compact test
    x = jax.random.normal(k_x, (2, input_channel, 16, 16), jnp.float32)  # NCHW like PyTorch

    params = init_discriminator_params(k_params, input_channel, hidden_channel)
    fwd = jax.jit(discriminator_forward)
    out = jax.block_until_ready(fwd(params, x))

    assert out.shape == (2, 1, 2, 2), out.shape   # 16 -> 16 -> 8 -> 4 -> 2 spatial, 1 channel
    assert bool(jnp.isfinite(out).all())
    print("KERNEL_OK")
</pallas_src>

<mosaic_0001>
module attributes {stable_mosaic.version = 11 : i64} {
  func.func @_gemm_bias_kernel(%arg0: i32, %arg1: i32, %arg2: memref<256x256xbf16, #tpu.memory_space<vmem>>, %arg3: memref<256x128xbf16, #tpu.memory_space<vmem>>, %arg4: memref<1x128xf32, #tpu.memory_space<vmem>>, %arg5: memref<256x128xf32, #tpu.memory_space<vmem>>, %arg6: memref<256x128xf32, #tpu.memory_space<vmem>>) attributes {dimension_semantics = [#tpu.dimension_semantics<parallel>, #tpu.dimension_semantics<arbitrary>], iteration_bounds = array<i64: 2, 1>, scalar_prefetch = 0 : i64, scratch_operands = 1 : i64, tpu.core_type = #tpu.core_type<tc>, window_params = [{transform_indices = @transform_0, window_bounds = array<i64: 256, 256>}, {transform_indices = @transform_1, window_bounds = array<i64: 256, 128>}, {pipeline_mode = #tpu.pipeline_mode<synchronous>, transform_indices = @transform_2, window_bounds = array<i64: 1, 128>}, {transform_indices = @transform_3, window_bounds = array<i64: 256, 128>}]} {
    %c0_i32 = arith.constant 0 : i32
    %0 = arith.cmpi eq, %arg1, %c0_i32 : i32
    %1 = arith.extui %0 : i1 to i32
    %c0_i32_0 = arith.constant 0 : i32
    %2 = arith.cmpi ne, %1, %c0_i32_0 : i32
    scf.if %2 {
      %cst_10 = arith.constant 0.000000e+00 : f32
      %12 = vector.broadcast %cst_10 : f32 to vector<256x128xf32>
      %c0_11 = arith.constant 0 : index
      %c0_12 = arith.constant 0 : index
      %13 = vector.load %arg6[%c0_11, %c0_12] : memref<256x128xf32, #tpu.memory_space<vmem>>, vector<256x128xf32>
      tpu.vector_store %arg6[%c0_11, %c0_12], %12 {strides = array<i32>} : memref<256x128xf32, #tpu.memory_space<vmem>>, vector<256x128xf32>,
    } else {
    }
    %c0 = arith.constant 0 : index
    %c0_1 = arith.constant 0 : index
    %3 = vector.load %arg6[%c0, %c0_1] : memref<256x128xf32, #tpu.memory_space<vmem>>, vector<256x128xf32>
    %c0_2 = arith.constant 0 : index
    %c0_3 = arith.constant 0 : index
    %4 = vector.load %arg2[%c0_2, %c0_3] : memref<256x256xbf16, #tpu.memory_space<vmem>>, vector<256x256xbf16>
    %c0_4 = arith.constant 0 : index
    %c0_5 = arith.constant 0 : index
    %5 = vector.load %arg3[%c0_4, %c0_5] : memref<256x128xbf16, #tpu.memory_space<vmem>>, vector<256x128xbf16>
    %cst = arith.constant dense<0.000000e+00> : vector<256x128xf32>
    %6 = tpu.matmul %4, %5, %cst {dimension_numbers = #tpu.dot_dimension_numbers<[1], [0], [0], [1], [0, 0, 1, 1], [], []>} : vector<256x256xbf16>, vector<256x128xbf16>, vector<256x128xf32> -> vector<256x128xf32>
    %7 = arith.addf %3, %6 : vector<256x128xf32>
    %c0_6 = arith.constant 0 : index
    %c0_7 = arith.constant 0 : index
    %8 = vector.load %arg6[%c0_6, %c0_7] : memref<256x128xf32, #tpu.memory_space<vmem>>, vector<256x128xf32>
    tpu.vector_store %arg6[%c0_6, %c0_7], %7 {strides = array<i32>} : memref<256x128xf32, #tpu.memory_space<vmem>>, vector<256x128xf32>,
    %c0_i32_8 = arith.constant 0 : i32
    %9 = arith.cmpi eq, %arg1, %c0_i32_8 : i32
    %10 = arith.extui %9 : i1 to i32
    %c0_i32_9 = arith.constant 0 : i32
    %11 = arith.cmpi ne, %10, %c0_i32_9 : i32
    scf.if %11 {
      %c0_10 = arith.constant 0 : index
      %c0_11 = arith.constant 0 : index
      %12 = vector.load %arg6[%c0_10, %c0_11] : memref<256x128xf32, #tpu.memory_space<vmem>>, vector<256x128xf32>
      %c0_12 = arith.constant 0 : index
      %c0_13 = arith.constant 0 : index
      %13 = vector.load %arg4[%c0_12, %c0_13] : memref<1x128xf32, #tpu.memory_space<vmem>>, vector<1x128xf32>
      %14 = vector.broadcast %13 : vector<1x128xf32> to vector<256x128xf32>
      %15 = arith.addf %12, %14 : vector<256x128xf32>
      %c0_14 = arith.constant 0 : index
      %c0_15 = arith.constant 0 : index
      %16 = vector.load %arg5[%c0_14, %c0_15] : memref<256x128xf32, #tpu.memory_space<vmem>>, vector<256x128xf32>
      tpu.vector_store %arg5[%c0_14, %c0_15], %15 {strides = array<i32>} : memref<256x128xf32, #tpu.memory_space<vmem>>, vector<256x128xf32>,
    } else {
    }
    return
  }
  func.func @transform_0(%arg0: i32, %arg1: i32) -> (i32, i32) {
    %c0_i32 = arith.constant 0 : i32
    return %arg0, %arg1 : i32, i32
  }
  func.func @transform_1(%arg0: i32, %arg1: i32) -> (i32, i32) {
    %c0_i32 = arith.constant 0 : i32
    %c0_i32_0 = arith.constant 0 : i32
    return %arg1, %c0_i32 : i32, i32
  }
  func.func @transform_2(%arg0: i32, %arg1: i32) -> (i32, i32) {
    %c0_i32 = arith.constant 0 : i32
    %c0_i32_0 = arith.constant 0 : i32
    %c0_i32_1 = arith.constant 0 : i32
    return %c0_i32, %c0_i32_0 : i32, i32
  }
  func.func @transform_3(%arg0: i32, %arg1: i32) -> (i32, i32) {
    %c0_i32 = arith.constant 0 : i32
    %c0_i32_0 = arith.constant 0 : i32
    return %arg0, %c0_i32 : i32, i32
  }
}

module attributes {stable_mosaic.version = 11 : i64} {
  func.func @_gemm_bias_kernel(%arg0: i32, %arg1: i32, %arg2: memref<128x128xbf16, #tpu.memory_space<vmem>>, %arg3: memref<128x128xbf16, #tpu.memory_space<vmem>>, %arg4: memref<1x128xf32, #tpu.memory_space<vmem>>, %arg5: memref<128x128xf32, #tpu.memory_space<vmem>>, %arg6: memref<128x128xf32, #tpu.memory_space<vmem>>) attributes {dimension_semantics = [#tpu.dimension_semantics<parallel>, #tpu.dimension_semantics<arbitrary>], iteration_bounds = array<i64: 1, 1>, scalar_prefetch = 0 : i64, scratch_operands = 1 : i64, tpu.core_type = #tpu.core_type<tc>, window_params = [{transform_indices = @transform_0, window_bounds = array<i64: 128, 128>}, {transform_indices = @transform_1, window_bounds = array<i64: 128, 128>}, {pipeline_mode = #tpu.pipeline_mode<synchronous>, transform_indices = @transform_2, window_bounds = array<i64: 1, 128>}, {transform_indices = @transform_3, window_bounds = array<i64: 128, 128>}]} {
    %c0_i32 = arith.constant 0 : i32
    %0 = arith.cmpi eq, %arg1, %c0_i32 : i32
    %1 = arith.extui %0 : i1 to i32
    %c0_i32_0 = arith.constant 0 : i32
    %2 = arith.cmpi ne, %1, %c0_i32_0 : i32
    scf.if %2 {
      %cst_10 = arith.constant 0.000000e+00 : f32
      %12 = vector.broadcast %cst_10 : f32 to vector<128x128xf32>
      %c0_11 = arith.constant 0 : index
      %c0_12 = arith.constant 0 : index
      %13 = vector.load %arg6[%c0_11, %c0_12] : memref<128x128xf32, #tpu.memory_space<vmem>>, vector<128x128xf32>
      tpu.vector_store %arg6[%c0_11, %c0_12], %12 {strides = array<i32>} : memref<128x128xf32, #tpu.memory_space<vmem>>, vector<128x128xf32>,
    } else {
    }
    %c0 = arith.constant 0 : index
    %c0_1 = arith.constant 0 : index
    %3 = vector.load %arg6[%c0, %c0_1] : memref<128x128xf32, #tpu.memory_space<vmem>>, vector<128x128xf32>
    %c0_2 = arith.constant 0 : index
    %c0_3 = arith.constant 0 : index
    %4 = vector.load %arg2[%c0_2, %c0_3] : memref<128x128xbf16, #tpu.memory_space<vmem>>, vector<128x128xbf16>
    %c0_4 = arith.constant 0 : index
    %c0_5 = arith.constant 0 : index
    %5 = vector.load %arg3[%c0_4, %c0_5] : memref<128x128xbf16, #tpu.memory_space<vmem>>, vector<128x128xbf16>
    %cst = arith.constant dense<0.000000e+00> : vector<128x128xf32>
    %6 = tpu.matmul %4, %5, %cst {dimension_numbers = #tpu.dot_dimension_numbers<[1], [0], [0], [1], [0, 0, 1, 1], [], []>} : vector<128x128xbf16>, vector<128x128xbf16>, vector<128x128xf32> -> vector<128x128xf32>
    %7 = arith.addf %3, %6 : vector<128x128xf32>
    %c0_6 = arith.constant 0 : index
    %c0_7 = arith.constant 0 : index
    %8 = vector.load %arg6[%c0_6, %c0_7] : memref<128x128xf32, #tpu.memory_space<vmem>>, vector<128x128xf32>
    tpu.vector_store %arg6[%c0_6, %c0_7], %7 {strides = array<i32>} : memref<128x128xf32, #tpu.memory_space<vmem>>, vector<128x128xf32>,
    %c0_i32_8 = arith.constant 0 : i32
    %9 = arith.cmpi eq, %arg1, %c0_i32_8 : i32
    %10 = arith.extui %9 : i1 to i32
    %c0_i32_9 = arith.constant 0 : i32
    %11 = arith.cmpi ne, %10, %c0_i32_9 : i32
    scf.if %11 {
      %c0_10 = arith.constant 0 : index
      %c0_11 = arith.constant 0 : index
      %12 = vector.load %arg6[%c0_10, %c0_11] : memref<128x128xf32, #tpu.memory_space<vmem>>, vector<128x128xf32>
      %c0_12 = arith.constant 0 : index
      %c0_13 = arith.constant 0 : index
      %13 = vector.load %arg4[%c0_12, %c0_13] : memref<1x128xf32, #tpu.memory_space<vmem>>, vector<1x128xf32>
      %14 = vector.broadcast %13 : vector<1x128xf32> to vector<128x128xf32>
      %15 = arith.addf %12, %14 : vector<128x128xf32>
      %cst_14 = arith.constant 0.000000e+00 : f32
      %16 = vector.broadcast %cst_14 : f32 to vector<128x128xf32>
      %17 = arith.cmpf ogt, %15, %16 : vector<128x128xf32>
      %cst_15 = arith.constant 2.000000e-01 : f32
      %18 = vector.broadcast %cst_15 : f32 to vector<128x128xf32>
      %19 = arith.mulf %18, %15 : vector<128x128xf32>
      %20 = arith.select %17, %15, %19 : vector<128x128xi1>, vector<128x128xf32>
      %c0_16 = arith.constant 0 : index
      %c0_17 = arith.constant 0 : index
      %21 = vector.load %arg5[%c0_16, %c0_17] : memref<128x128xf32, #tpu.memory_space<vmem>>, vector<128x128xf32>
      tpu.vector_store %arg5[%c0_16, %c0_17], %20 {strides = array<i32>} : memref<128x128xf32, #tpu.memory_space<vmem>>, vector<128x128xf32>,
    } else {
    }
    return
  }
  func.func @transform_0(%arg0: i32, %arg1: i32) -> (i32, i32) {
    %c0_i32 = arith.constant 0 : i32
    return %arg0, %arg1 : i32, i32
  }
  func.func @transform_1(%arg0: i32, %arg1: i32) -> (i32, i32) {
    %c0_i32 = arith.constant 0 : i32
    %c0_i32_0 = arith.constant 0 : i32
    return %arg1, %c0_i32 : i32, i32
  }
  func.func @transform_2(%arg0: i32, %arg1: i32) -> (i32, i32) {
    %c0_i32 = arith.constant 0 : i32
    %c0_i32_0 = arith.constant 0 : i32
    %c0_i32_1 = arith.constant 0 : i32
    return %c0_i32, %c0_i32_0 : i32, i32
  }
  func.func @transform_3(%arg0: i32, %arg1: i32) -> (i32, i32) {
    %c0_i32 = arith.constant 0 : i32
    %c0_i32_0 = arith.constant 0 : i32
    return %arg0, %c0_i32 : i32, i32
  }
}

module attributes {stable_mosaic.version = 11 : i64} {
  func.func @_conv_in_lrelu_kernel(%arg0: i32, %arg1: i32, %arg2: memref<1x16x256xbf16, #tpu.memory_space<vmem>>, %arg3: memref<256x128xbf16, #tpu.memory_space<vmem>>, %arg4: memref<1x128xf32, #tpu.memory_space<vmem>>, %arg5: memref<1x16x128xf32, #tpu.memory_space<vmem>>, %arg6: memref<16x128xf32, #tpu.memory_space<vmem>>) attributes {dimension_semantics = [#tpu.dimension_semantics<parallel>, #tpu.dimension_semantics<arbitrary>], iteration_bounds = array<i64: 2, 1>, scalar_prefetch = 0 : i64, scratch_operands = 1 : i64, tpu.core_type = #tpu.core_type<tc>, window_params = [{transform_indices = @transform_0, window_bounds = array<i64: 1, 16, 256>}, {transform_indices = @transform_1, window_bounds = array<i64: 256, 128>}, {pipeline_mode = #tpu.pipeline_mode<synchronous>, transform_indices = @transform_2, window_bounds = array<i64: 1, 128>}, {transform_indices = @transform_3, window_bounds = array<i64: 1, 16, 128>}]} {
    %c0_i32 = arith.constant 0 : i32
    %0 = arith.cmpi eq, %arg1, %c0_i32 : i32
    %1 = arith.extui %0 : i1 to i32
    %c0_i32_0 = arith.constant 0 : i32
    %2 = arith.cmpi ne, %1, %c0_i32_0 : i32
    scf.if %2 {
      %cst_11 = arith.constant 0.000000e+00 : f32
      %13 = vector.broadcast %cst_11 : f32 to vector<16x128xf32>
      %c0_12 = arith.constant 0 : index
      %c0_13 = arith.constant 0 : index
      %14 = vector.load %arg6[%c0_12, %c0_13] : memref<16x128xf32, #tpu.memory_space<vmem>>, vector<16x128xf32>
      tpu.vector_store %arg6[%c0_12, %c0_13], %13 {strides = array<i32>} : memref<16x128xf32, #tpu.memory_space<vmem>>, vector<16x128xf32>,
    } else {
    }
    %c0 = arith.constant 0 : index
    %c0_1 = arith.constant 0 : index
    %3 = vector.load %arg6[%c0, %c0_1] : memref<16x128xf32, #tpu.memory_space<vmem>>, vector<16x128xf32>
    %c0_2 = arith.constant 0 : index
    %c0_3 = arith.constant 0 : index
    %c0_4 = arith.constant 0 : index
    %4 = vector.load %arg2[%c0_2, %c0_3, %c0_4] : memref<1x16x256xbf16, #tpu.memory_space<vmem>>, vector<1x16x256xbf16>
    %5 = vector.shape_cast %4 : vector<1x16x256xbf16> to vector<16x256xbf16>
    %c0_5 = arith.constant 0 : index
    %c0_6 = arith.constant 0 : index
    %6 = vector.load %arg3[%c0_5, %c0_6] : memref<256x128xbf16, #tpu.memory_space<vmem>>, vector<256x128xbf16>
    %cst = arith.constant dense<0.000000e+00> : vector<16x128xf32>
    %7 = tpu.matmul %5, %6, %cst {dimension_numbers = #tpu.dot_dimension_numbers<[1], [0], [0], [1], [0, 0, 1, 1], [], []>} : vector<16x256xbf16>, vector<256x128xbf16>, vector<16x128xf32> -> vector<16x128xf32>
    %8 = arith.addf %3, %7 : vector<16x128xf32>
    %c0_7 = arith.constant 0 : index
    %c0_8 = arith.constant 0 : index
    %9 = vector.load %arg6[%c0_7, %c0_8] : memref<16x128xf32, #tpu.memory_space<vmem>>, vector<16x128xf32>
    tpu.vector_store %arg6[%c0_7, %c0_8], %8 {strides = array<i32>} : memref<16x128xf32, #tpu.memory_space<vmem>>, vector<16x128xf32>,
    %c0_i32_9 = arith.constant 0 : i32
    %10 = arith.cmpi eq, %arg1, %c0_i32_9 : i32
    %11 = arith.extui %10 : i1 to i32
    %c0_i32_10 = arith.constant 0 : i32
    %12 = arith.cmpi ne, %11, %c0_i32_10 : i32
    scf.if %12 {
      %c0_11 = arith.constant 0 : index
      %c0_12 = arith.constant 0 : index
      %13 = vector.load %arg6[%c0_11, %c0_12] : memref<16x128xf32, #tpu.memory_space<vmem>>, vector<16x128xf32>
      %c0_13 = arith.constant 0 : index
      %c0_14 = arith.constant 0 : index
      %14 = vector.load %arg4[%c0_13, %c0_14] : memref<1x128xf32, #tpu.memory_space<vmem>>, vector<1x128xf32>
      %15 = vector.broadcast %14 : vector<1x128xf32> to vector<16x128xf32>
      %16 = arith.addf %13, %15 : vector<16x128xf32>
      %cst_15 = arith.constant dense<0.000000e+00> : vector<128xf32>
      %17 = vector.multi_reduction <add>, %16, %cst_15 [0] : vector<16x128xf32> to vector<128xf32>
      %18 = vector.shape_cast %17 : vector<128xf32> to vector<1x128xf32>
      %cst_16 = arith.constant 1.600000e+01 : f32
      %19 = vector.broadcast %cst_16 : f32 to vector<1x128xf32>
      %20 = arith.divf %18, %19 : vector<1x128xf32>
      %21 = vector.broadcast %20 : vector<1x128xf32> to vector<16x128xf32>
      %22 = arith.subf %16, %21 : vector<16x128xf32>
      %23 = arith.mulf %22, %22 : vector<16x128xf32>
      %cst_17 = arith.constant dense<0.000000e+00> : vector<128xf32>
      %24 = vector.multi_reduction <add>, %23, %cst_17 [0] : vector<16x128xf32> to vector<128xf32>
      %25 = vector.shape_cast %24 : vector<128xf32> to vector<1x128xf32>
      %cst_18 = arith.constant 1.600000e+01 : f32
      %26 = vector.broadcast %cst_18 : f32 to vector<1x128xf32>
      %27 = arith.divf %25, %26 : vector<1x128xf32>
      %28 = vector.broadcast %20 : vector<1x128xf32> to vector<16x128xf32>
      %29 = arith.subf %16, %28 : vector<16x128xf32>
      %cst_19 = arith.constant 9.99999974E-6 : f32
      %30 = vector.broadcast %cst_19 : f32 to vector<1x128xf32>
      %31 = arith.addf %27, %30 : vector<1x128xf32>
      %32 = math.rsqrt %31 : vector<1x128xf32>
      %33 = vector.broadcast %32 : vector<1x128xf32> to vector<16x128xf32>
      %34 = arith.mulf %29, %33 : vector<16x128xf32>
      %cst_20 = arith.constant 0.000000e+00 : f32
      %35 = vector.broadcast %cst_20 : f32 to vector<16x128xf32>
      %36 = arith.cmpf ogt, %34, %35 : vector<16x128xf32>
      %cst_21 = arith.constant 2.000000e-01 : f32
      %37 = vector.broadcast %cst_21 : f32 to vector<16x128xf32>
      %38 = arith.mulf %37, %34 : vector<16x128xf32>
      %39 = arith.select %36, %34, %38 : vector<16x128xi1>, vector<16x128xf32>
      %40 = vector.shape_cast %39 : vector<16x128xf32> to vector<1x16x128xf32>
      %c0_22 = arith.constant 0 : index
      %c0_23 = arith.constant 0 : index
      %c0_24 = arith.constant 0 : index
      %41 = vector.load %arg5[%c0_22, %c0_23, %c0_24] : memref<1x16x128xf32, #tpu.memory_space<vmem>>, vector<1x16x128xf32>
      tpu.vector_store %arg5[%c0_22, %c0_23, %c0_24], %40 {strides = array<i32>} : memref<1x16x128xf32, #tpu.memory_space<vmem>>, vector<1x16x128xf32>,
    } else {
    }
    return
  }
  func.func @transform_0(%arg0: i32, %arg1: i32) -> (i32, i32, i32) {
    %c0_i32 = arith.constant 0 : i32
    %c0_i32_0 = arith.constant 0 : i32
    return %arg0, %c0_i32, %arg1 : i32, i32, i32
  }
  func.func @transform_1(%arg0: i32, %arg1: i32) -> (i32, i32) {
    %c0_i32 = arith.constant 0 : i32
    %c0_i32_0 = arith.constant 0 : i32
    return %arg1, %c0_i32 : i32, i32
  }
  func.func @transform_2(%arg0: i32, %arg1: i32) -> (i32, i32) {
    %c0_i32 = arith.constant 0 : i32
    %c0_i32_0 = arith.constant 0 : i32
    %c0_i32_1 = arith.constant 0 : i32
    return %c0_i32, %c0_i32_0 : i32, i32
  }
  func.func @transform_3(%arg0: i32, %arg1: i32) -> (i32, i32, i32) {
    %c0_i32 = arith.constant 0 : i32
    %c0_i32_0 = arith.constant 0 : i32
    %c0_i32_1 = arith.constant 0 : i32
    return %arg0, %c0_i32, %c0_i32_0 : i32, i32, i32
  }
}

module attributes {stable_mosaic.version = 11 : i64} {
  func.func @_conv_in_lrelu_final_kernel(%arg0: i32, %arg1: i32, %arg2: memref<1x4x512xbf16, #tpu.memory_space<vmem>>, %arg3: memref<512x128xbf16, #tpu.memory_space<vmem>>, %arg4: memref<1x128xf32, #tpu.memory_space<vmem>>, %arg5: memref<128x128xf32, #tpu.memory_space<vmem>>, %arg6: memref<1x128xf32, #tpu.memory_space<vmem>>, %arg7: memref<1x4x128xf32, #tpu.memory_space<vmem>>, %arg8: memref<4x128xf32, #tpu.memory_space<vmem>>) attributes {dimension_semantics = [#tpu.dimension_semantics<parallel>, #tpu.dimension_semantics<arbitrary>], iteration_bounds = array<i64: 2, 1>, scalar_prefetch = 0 : i64, scratch_operands = 1 : i64, tpu.core_type = #tpu.core_type<tc>, window_params = [{transform_indices = @transform_0, window_bounds = array<i64: 1, 4, 512>}, {transform_indices = @transform_1, window_bounds = array<i64: 512, 128>}, {pipeline_mode = #tpu.pipeline_mode<synchronous>, transform_indices = @transform_2, window_bounds = array<i64: 1, 128>}, {pipeline_mode = #tpu.pipeline_mode<synchronous>, transform_indices = @transform_3, window_bounds = array<i64: 128, 128>}, {pipeline_mode = #tpu.pipeline_mode<synchronous>, transform_indices = @transform_4, window_bounds = array<i64: 1, 128>}, {transform_indices = @transform_5, window_bounds = array<i64: 1, 4, 128>}]} {
    %c0_i32 = arith.constant 0 : i32
    %0 = arith.cmpi eq, %arg1, %c0_i32 : i32
    %1 = arith.extui %0 : i1 to i32
    %c0_i32_0 = arith.constant 0 : i32
    %2 = arith.cmpi ne, %1, %c0_i32_0 : i32
    scf.if %2 {
      %cst_11 = arith.constant 0.000000e+00 : f32
      %13 = vector.broadcast %cst_11 : f32 to vector<4x128xf32>
      %c0_12 = arith.constant 0 : index
      %c0_13 = arith.constant 0 : index
      %14 = vector.load %arg8[%c0_12, %c0_13] : memref<4x128xf32, #tpu.memory_space<vmem>>, vector<4x128xf32>
      tpu.vector_store %arg8[%c0_12, %c0_13], %13 {strides = array<i32>} : memref<4x128xf32, #tpu.memory_space<vmem>>, vector<4x128xf32>,
    } else {
    }
    %c0 = arith.constant 0 : index
    %c0_1 = arith.constant 0 : index
    %3 = vector.load %arg8[%c0, %c0_1] : memref<4x128xf32, #tpu.memory_space<vmem>>, vector<4x128xf32>
    %c0_2 = arith.constant 0 : index
    %c0_3 = arith.constant 0 : index
    %c0_4 = arith.constant 0 : index
    %4 = vector.load %arg2[%c0_2, %c0_3, %c0_4] : memref<1x4x512xbf16, #tpu.memory_space<vmem>>, vector<1x4x512xbf16>
    %5 = vector.shape_cast %4 : vector<1x4x512xbf16> to vector<4x512xbf16>
    %c0_5 = arith.constant 0 : index
    %c0_6 = arith.constant 0 : index
    %6 = vector.load %arg3[%c0_5, %c0_6] : memref<512x128xbf16, #tpu.memory_space<vmem>>, vector<512x128xbf16>
    %cst = arith.constant dense<0.000000e+00> : vector<4x128xf32>
    %7 = tpu.matmul %5, %6, %cst {dimension_numbers = #tpu.dot_dimension_numbers<[1], [0], [0], [1], [0, 0, 1, 1], [], []>} : vector<4x512xbf16>, vector<512x128xbf16>, vector<4x128xf32> -> vector<4x128xf32>
    %8 = arith.addf %3, %7 : vector<4x128xf32>
    %c0_7 = arith.constant 0 : index
    %c0_8 = arith.constant 0 : index
    %9 = vector.load %arg8[%c0_7, %c0_8] : memref<4x128xf32, #tpu.memory_space<vmem>>, vector<4x128xf32>
    tpu.vector_store %arg8[%c0_7, %c0_8], %8 {strides = array<i32>} : memref<4x128xf32, #tpu.memory_space<vmem>>, vector<4x128xf32>,
    %c0_i32_9 = arith.constant 0 : i32
    %10 = arith.cmpi eq, %arg1, %c0_i32_9 : i32
    %11 = arith.extui %10 : i1 to i32
    %c0_i32_10 = arith.constant 0 : i32
    %12 = arith.cmpi ne, %11, %c0_i32_10 : i32
    scf.if %12 {
      %c0_11 = arith.constant 0 : index
      %c0_12 = arith.constant 0 : index
      %13 = vector.load %arg8[%c0_11, %c0_12] : memref<4x128xf32, #tpu.memory_space<vmem>>, vector<4x128xf32>
      %c0_13 = arith.constant 0 : index
      %c0_14 = arith.constant 0 : index
      %14 = vector.load %arg4[%c0_13, %c0_14] : memref<1x128xf32, #tpu.memory_space<vmem>>, vector<1x128xf32>
      %15 = vector.broadcast %14 : vector<1x128xf32> to vector<4x128xf32>
      %16 = arith.addf %13, %15 : vector<4x128xf32>
      %cst_15 = arith.constant dense<0.000000e+00> : vector<128xf32>
      %17 = vector.multi_reduction <add>, %16, %cst_15 [0] : vector<4x128xf32> to vector<128xf32>
      %18 = vector.shape_cast %17 : vector<128xf32> to vector<1x128xf32>
      %cst_16 = arith.constant 4.000000e+00 : f32
      %19 = vector.broadcast %cst_16 : f32 to vector<1x128xf32>
      %20 = arith.divf %18, %19 : vector<1x128xf32>
      %21 = vector.broadcast %20 : vector<1x128xf32> to vector<4x128xf32>
      %22 = arith.subf %16, %21 : vector<4x128xf32>
      %23 = arith.mulf %22, %22 : vector<4x128xf32>
      %cst_17 = arith.constant dense<0.000000e+00> : vector<128xf32>
      %24 = vector.multi_reduction <add>, %23, %cst_17 [0] : vector<4x128xf32> to vector<128xf32>
      %25 = vector.shape_cast %24 : vector<128xf32> to vector<1x128xf32>
      %cst_18 = arith.constant 4.000000e+00 : f32
      %26 = vector.broadcast %cst_18 : f32 to vector<1x128xf32>
      %27 = arith.divf %25, %26 : vector<1x128xf32>
      %28 = vector.broadcast %20 : vector<1x128xf32> to vector<4x128xf32>
      %29 = arith.subf %16, %28 : vector<4x128xf32>
      %cst_19 = arith.constant 9.99999974E-6 : f32
      %30 = vector.broadcast %cst_19 : f32 to vector<1x128xf32>
      %31 = arith.addf %27, %30 : vector<1x128xf32>
      %32 = math.rsqrt %31 : vector<1x128xf32>
      %33 = vector.broadcast %32 : vector<1x128xf32> to vector<4x128xf32>
      %34 = arith.mulf %29, %33 : vector<4x128xf32>
      %cst_20 = arith.constant 0.000000e+00 : f32
      %35 = vector.broadcast %cst_20 : f32 to vector<4x128xf32>
      %36 = arith.cmpf ogt, %34, %35 : vector<4x128xf32>
      %cst_21 = arith.constant 2.000000e-01 : f32
      %37 = vector.broadcast %cst_21 : f32 to vector<4x128xf32>
      %38 = arith.mulf %37, %34 : vector<4x128xf32>
      %39 = arith.select %36, %34, %38 : vector<4x128xi1>, vector<4x128xf32>
      %c0_22 = arith.constant 0 : index
      %c0_23 = arith.constant 0 : index
      %40 = vector.load %arg5[%c0_22, %c0_23] : memref<128x128xf32, #tpu.memory_space<vmem>>, vector<128x128xf32>
      %cst_24 = arith.constant dense<0.000000e+00> : vector<4x128xf32>
      %41 = tpu.matmul %39, %40, %cst_24 {dimension_numbers = #tpu.dot_dimension_numbers<[1], [0], [0], [1], [0, 0, 1, 1], [], []>} : vector<4x128xf32>, vector<128x128xf32>, vector<4x128xf32> -> vector<4x128xf32>
      %c0_25 = arith.constant 0 : index
      %c0_26 = arith.constant 0 : index
      %42 = vector.load %arg6[%c0_25, %c0_26] : memref<1x128xf32, #tpu.memory_space<vmem>>, vector<1x128xf32>
      %43 = vector.broadcast %42 : vector<1x128xf32> to vector<4x128xf32>
      %44 = arith.addf %41, %43 : vector<4x128xf32>
      %45 = vector.shape_cast %44 : vector<4x128xf32> to vector<1x4x128xf32>
      %c0_27 = arith.constant 0 : index
      %c0_28 = arith.constant 0 : index
      %c0_29 = arith.constant 0 : index
      %46 = vector.load %arg7[%c0_27, %c0_28, %c0_29] : memref<1x4x128xf32, #tpu.memory_space<vmem>>, vector<1x4x128xf32>
      tpu.vector_store %arg7[%c0_27, %c0_28, %c0_29], %45 {strides = array<i32>} : memref<1x4x128xf32, #tpu.memory_space<vmem>>, vector<1x4x128xf32>,
    } else {
    }
    return
  }
  func.func @transform_0(%arg0: i32, %arg1: i32) -> (i32, i32, i32) {
    %c0_i32 = arith.constant 0 : i32
    %c0_i32_0 = arith.constant 0 : i32
    return %arg0, %c0_i32, %arg1 : i32, i32, i32
  }
  func.func @transform_1(%arg0: i32, %arg1: i32) -> (i32, i32) {
    %c0_i32 = arith.constant 0 : i32
    %c0_i32_0 = arith.constant 0 : i32
    return %arg1, %c0_i32 : i32, i32
  }
  func.func @transform_2(%arg0: i32, %arg1: i32) -> (i32, i32) {
    %c0_i32 = arith.constant 0 : i32
    %c0_i32_0 = arith.constant 0 : i32
    %c0_i32_1 = arith.constant 0 : i32
    return %c0_i32, %c0_i32_0 : i32, i32
  }
  func.func @transform_3(%arg0: i32, %arg1: i32) -> (i32, i32) {
    %c0_i32 = arith.constant 0 : i32
    %c0_i32_0 = arith.constant 0 : i32
    %c0_i32_1 = arith.constant 0 : i32
    return %c0_i32, %c0_i32_0 : i32, i32
  }
  func.func @transform_4(%arg0: i32, %arg1: i32) -> (i32, i32) {
    %c0_i32 = arith.constant 0 : i32
    %c0_i32_0 = arith.constant 0 : i32
    %c0_i32_1 = arith.constant 0 : i32
    return %c0_i32, %c0_i32_0 : i32, i32
  }
  func.func @transform_5(%arg0: i32, %arg1: i32) -> (i32, i32, i32) {
    %c0_i32 = arith.constant 0 : i32
    %c0_i32_0 = arith.constant 0 : i32
    %c0_i32_1 = arith.constant 0 : i32
    return %arg0, %c0_i32, %c0_i32_0 : i32, i32, i32
  }
}

</mosaic_0001>

<bundles_post_ra>
// kernel: discriminator_forward.4
= control target key start
LH: loop header
LB: loop body
LE: loop exit
PB: predicated region body
PF: predicated region fallthrough
CT: control target
= control target key end

     0   :  { %s1385_s12 = smov 0   ;;  %s1387_s13 = smov 0   ;;  %s1613_s0 = inlined_call_operand.vmem [shape: bf16[512,256], index: 0, kind: input, shape index: {}]   ;;  %s1614_s1 = inlined_call_operand.vmem [shape: bf16[256,128], index: 1, kind: input, shape index: {}]   ;;  %s1615_s2 = inlined_call_operand.vmem [shape: f32[1,128], index: 2, kind: input, shape index: {}]   ;;  %s1616_s3 = inlined_call_operand.vmem [shape: f32[512,128], index: 3, kind: output, shape index: {}]  }
   0x1   :  { %s1389_s14 = smov 0  }
   0x2 LB: > { %s25_s15 = sadd.s32 1, %s1359_s13  ;;  %p1051_p0 = scmp.ge.s32.totalorder %s1363_s14, 1  ;;  %s1363_s14 = sphi %s1389_s14, %s13_s14   ;;  %s1359_s13 = sphi %s1387_s13, %s1618_s13   ;;  %s1355_s12 = sphi %s1385_s12, %s1617_s12  }
   0x3   : > { %p27_p1 = scmp.ge.s32.totalorder %s25_s15, 2  ;;  %p169_p2 = scmp.lt.s32.totalorder %s1363_s14, 3 }
   0x5   : > { %s1620_s15 = smov (%p27_p1, %s25_s15), 0  ;;  %p170_p3 = pnand %p1051_p0, %p169_p2 }
   0x6   : > { %s1052_s28 = sshll.u32 (!%p170_p3), %s1355_s12, 5 }
   0x7   : > { %173 = sbr.rel (%p170_p3) target bundleno = 302 (0x12e), region = 32  ;;  %p205_p4 = scmp.lt.s32.totalorder (!%p170_p3), %s1052_s28, 63 }
   0xc   : > { %v1291_v0 = vld [vmem:[%s1614_s1 + $0x38] sm:$0xff]  ;;  %v1290_v2 = vld [vmem:[%s1614_s1 + $0x30] sm:$0xff]  ;;  %v1289_v4 = vld [vmem:[%s1614_s1 + $0x28] sm:$0xff]  ;;  %s1622_s28 = smov (!%p205_p4, %s1052_s28), 63 }
   0xd   : > { %v1299_v1 = vld [vmem:[%s1614_s1 + $0x78] sm:$0xff]  ;;  %615 = vmatpush.bf16.msra.mxu0 %v1291_v0  ;;  %1300 = vmatpush.bf16.msra.mxu2 %v1291_v0  ;;  %v1298_v3 = vld [vmem:[%s1614_s1 + $0x70] sm:$0xff]  ;;  %v1297_v5 = vld [vmem:[%s1614_s1 + $0x68] sm:$0xff]  ;;  %s1251_s17 = sshll.u32 %s1622_s28, 3 }
   0xe   : > { %704 = vmatpush.bf16.msra.mxu1 %v1299_v1  ;;  %1308 = vmatpush.bf16.msra.mxu3 %v1299_v1  ;;  %v1288_v6 = vld [vmem:[%s1614_s1 + $0x20] sm:$0xff]  ;;  %v1287_v8 = vld [vmem:[%s1614_s1 + $0x18] sm:$0xff]  ;;  %v1286_v10 = vld [vmem:[%s1614_s1 + $0x10] sm:$0xff]  ;;  %s1453_s22 = scalar_lea.vmem %s1613_s0, %s1251_s17  ;;  %s1538_s7 = scalar_lea.vmem %s1616_s3, %s1251_s17 }
   0xf   : > { %v1296_v7 = vld [vmem:[%s1614_s1 + $0x60] sm:$0xff]  ;;  %v1295_v9 = vld [vmem:[%s1614_s1 + $0x58] sm:$0xff]  ;;  %v1294_v11 = vld [vmem:[%s1614_s1 + $0x50] sm:$0xff] }
  0x10   : > { %v1285_v12 = vld [vmem:[%s1614_s1 + $0x8] sm:$0xff]  ;;  %v1284_v14 = vld [vmem:[%s1614_s1] sm:$0xff]  ;;  %v1067_v28 = vld [vmem:[%s1453_s22 + $0x10] sm:$0xf] }
  0x11   : > { %616 = vmatpush.bf16.msra.mxu0 %v1290_v2  ;;  %1301 = vmatpush.bf16.msra.mxu2 %v1290_v2  ;;  %v1293_v13 = vld [vmem:[%s1614_s1 + $0x48] sm:$0xff]  ;;  %v1292_v15 = vld [vmem:[%s1614_s1 + $0x40] sm:$0xff]  ;;  %v1255_v29 = vld [vmem:[%s1453_s22 + $0x14] sm:$0xf0] }
  0x12   : > { %705 = vmatpush.bf16.msra.mxu1 %v1298_v3  ;;  %1309 = vmatpush.bf16.msra.mxu3 %v1298_v3  ;;  %v1059_v16 = vld [vmem:[%s1453_s22] sm:$0xf]  ;;  %v1253_v17 = vld [vmem:[%s1453_s22 + $0x4] sm:$0xf0]  ;;  %v1252_v20 = vld [vmem:[%s1453_s22 + $0x4] sm:$0xf]  ;;  %v1068_v36 = vor.u32 %v1255_v29, %v1067_v28 }
  0x13   : > { %v1123_v18 = vld [vmem:[%s1453_s22 + $0x80] sm:$0xf]  ;;  %v1269_v19 = vld [vmem:[%s1453_s22 + $0x84] sm:$0xf0]  ;;  %v1061_v21 = vld [vmem:[%s1453_s22 + $0x8] sm:$0xf0]  ;;  %v1060_v24 = vor.u32 %v1253_v17, %v1059_v16 }
  0x14   : > { %v1268_v22 = vld [vmem:[%s1453_s22 + $0x84] sm:$0xf]  ;;  %v1125_v23 = vld [vmem:[%s1453_s22 + $0x88] sm:$0xf0]  ;;  %v1124_v25 = vor.u32 %v1269_v19, %v1123_v18  ;;  %v1064_v26 = vor.u32 %v1252_v20, %v1061_v21  ;;  %v1131_v30 = vld [vmem:[%s1453_s22 + $0x90] sm:$0xf] }
  0x15   : > { %617 = vmatpush.bf16.msra.mxu0 %v1289_v4  ;;  %1302 = vmatpush.bf16.msra.mxu2 %v1289_v4  ;;  %v1128_v27 = vor.u32 %v1268_v22, %v1125_v23  ;;  %v1271_v31 = vld [vmem:[%s1453_s22 + $0x94] sm:$0xf0]  ;;  %v1254_v32 = vld [vmem:[%s1453_s22 + $0x14] sm:$0xf]  ;;  %v1069_v33 = vld [vmem:[%s1453_s22 + $0x18] sm:$0xf0] }
  0x16   : > { %706 = vmatpush.bf16.msra.mxu1 %v1297_v5  ;;  %1310 = vmatpush.bf16.msra.mxu3 %v1297_v5  ;;  %v1270_v34 = vld [vmem:[%s1453_s22 + $0x94] sm:$0xf]  ;;  %v1133_v35 = vld [vmem:[%s1453_s22 + $0x98] sm:$0xf0]  ;;  %v1132_v37 = vor.u32 %v1271_v31, %v1131_v30  ;;  %v1072_v38 = vor.u32 %v1254_v32, %v1069_v33  ;;  %v1075_v40 = vld [vmem:[%s1453_s22 + $0x20] sm:$0xf] }
  0x17   : > { %v1136_v39 = vor.u32 %v1270_v34, %v1133_v35  ;;  %v1257_v41 = vld [vmem:[%s1453_s22 + $0x24] sm:$0xf0]  ;;  %v1139_v42 = vld [vmem:[%s1453_s22 + $0xa0] sm:$0xf]  ;;  %v1256_v44 = vld [vmem:[%s1453_s22 + $0x24] sm:$0xf] }
  0x18   : > { %v1273_v43 = vld [vmem:[%s1453_s22 + $0xa4] sm:$0xf0]  ;;  %v1077_v45 = vld [vmem:[%s1453_s22 + $0x28] sm:$0xf0]  ;;  %v1272_v46 = vld [vmem:[%s1453_s22 + $0xa4] sm:$0xf]  ;;  %v1076_v48 = vor.u32 %v1257_v41, %v1075_v40 }
  0x19   : > { %618 = vmatpush.bf16.msra.mxu0 %v1288_v6  ;;  %1303 = vmatpush.bf16.msra.mxu2 %v1288_v6  ;;  %v1141_v47 = vld [vmem:[%s1453_s22 + $0xa8] sm:$0xf0]  ;;  %v1140_v49 = vor.u32 %v1273_v43, %v1139_v42  ;;  %v1080_v50 = vor.u32 %v1256_v44, %v1077_v45  ;;  %v1083_v52 = vld [vmem:[%s1453_s22 + $0x30] sm:$0xf]  ;;  %v1259_v53 = vld [vmem:[%s1453_s22 + $0x34] sm:$0xf0] }
  0x1a   : > { %707 = vmatpush.bf16.msra.mxu1 %v1296_v7  ;;  %1311 = vmatpush.bf16.msra.mxu3 %v1296_v7  ;;  %v1144_v51 = vor.u32 %v1272_v46, %v1141_v47  ;;  %v1147_v54 = vld [vmem:[%s1453_s22 + $0xb0] sm:$0xf]  ;;  %v1275_v55 = vld [vmem:[%s1453_s22 + $0xb4] sm:$0xf0]  ;;  %v1258_v56 = vld [vmem:[%s1453_s22 + $0x34] sm:$0xf]  ;;  %v1084_v60 = vor.u32 %v1259_v53, %v1083_v52 }
  0x1b   : > { %v1085_v57 = vld [vmem:[%s1453_s22 + $0x38] sm:$0xf0]  ;;  %v1274_v58 = vld [vmem:[%s1453_s22 + $0xb4] sm:$0xf]  ;;  %v1148_v61 = vor.u32 %v1275_v55, %v1147_v54  ;;  %v1091_v0 = vld [vmem:[%s1453_s22 + $0x40] sm:$0xf] }
  0x1c   : > { %v1149_v59 = vld [vmem:[%s1453_s22 + $0xb8] sm:$0xf0]  ;;  %v1088_v62 = vor.u32 %v1258_v56, %v1085_v57  ;;  %v1261_v1 = vld [vmem:[%s1453_s22 + $0x44] sm:$0xf0]  ;;  %v1155_v2 = vld [vmem:[%s1453_s22 + $0xc0] sm:$0xf] }
  0x1d   : > { %619 = vmatpush.bf16.msra.mxu0 %v1287_v8  ;;  %1304 = vmatpush.bf16.msra.mxu2 %v1287_v8  ;;  %v1152_v63 = vor.u32 %v1274_v58, %v1149_v59  ;;  %v1277_v3 = vld [vmem:[%s1453_s22 + $0xc4] sm:$0xf0]  ;;  %v1260_v4 = vld [vmem:[%s1453_s22 + $0x44] sm:$0xf]  ;;  %v1093_v5 = vld [vmem:[%s1453_s22 + $0x48] sm:$0xf0]  ;;  %v1092_v8 = vor.u32 %v1261_v1, %v1091_v0 }
  0x1e   : > { %708 = vmatpush.bf16.msra.mxu1 %v1295_v9  ;;  %1312 = vmatpush.bf16.msra.mxu3 %v1295_v9  ;;  %v1276_v6 = vld [vmem:[%s1453_s22 + $0xc4] sm:$0xf]  ;;  %v1157_v7 = vld [vmem:[%s1453_s22 + $0xc8] sm:$0xf0]  ;;  %v1156_v9 = vor.u32 %v1277_v3, %v1155_v2  ;;  %v1262_v16 = vld [vmem:[%s1453_s22 + $0x54] sm:$0xf] }
  0x1f   : > { %v1101_v17 = vld [vmem:[%s1453_s22 + $0x58] sm:$0xf0]  ;;  %v1278_v18 = vld [vmem:[%s1453_s22 + $0xd4] sm:$0xf]  ;;  %v1264_v28 = vld [vmem:[%s1453_s22 + $0x64] sm:$0xf] }
  0x20   : > { %v1165_v19 = vld [vmem:[%s1453_s22 + $0xd8] sm:$0xf0]  ;;  %v1104_v22 = vor.u32 %v1262_v16, %v1101_v17  ;;  %v1109_v29 = vld [vmem:[%s1453_s22 + $0x68] sm:$0xf0]  ;;  %v1280_v30 = vld [vmem:[%s1453_s22 + $0xe4] sm:$0xf] }
  0x21   : > { %620 = vmatpush.bf16.msra.mxu0 %v1286_v10  ;;  %1305 = vmatpush.bf16.msra.mxu2 %v1286_v10  ;;  %v1096_v10 = vor.u32 %v1260_v4, %v1093_v5  ;;  %v1168_v23 = vor.u32 %v1278_v18, %v1165_v19  ;;  %v1173_v31 = vld [vmem:[%s1453_s22 + $0xe8] sm:$0xf0]  ;;  %v1112_v34 = vor.u32 %v1264_v28, %v1109_v29  ;;  %v1266_v40 = vld [vmem:[%s1453_s22 + $0x74] sm:$0xf]  ;;  %v1117_v41 = vld [vmem:[%s1453_s22 + $0x78] sm:$0xf0] }
  0x22   : > { %709 = vmatpush.bf16.msra.mxu1 %v1294_v11  ;;  %1313 = vmatpush.bf16.msra.mxu3 %v1294_v11  ;;  %v1160_v11 = vor.u32 %v1276_v6, %v1157_v7  ;;  %v1176_v35 = vor.u32 %v1280_v30, %v1173_v31  ;;  %v1282_v42 = vld [vmem:[%s1453_s22 + $0xf4] sm:$0xf]  ;;  %v1181_v43 = vld [vmem:[%s1453_s22 + $0xf8] sm:$0xf0]  ;;  %v1120_v46 = vor.u32 %v1266_v40, %v1117_v41 }
  0x23   : > { %v1184_v47 = vor.u32 %v1282_v42, %v1181_v43 }
  0x25   : > { %621 = vmatpush.bf16.msra.mxu0 %v1285_v12  ;;  %1306 = vmatpush.bf16.msra.mxu2 %v1285_v12  ;;  %v1099_v12 = vld [vmem:[%s1453_s22 + $0x50] sm:$0xf] }
  0x26   : > { %710 = vmatpush.bf16.msra.mxu1 %v1293_v13  ;;  %1314 = vmatpush.bf16.msra.mxu3 %v1293_v13  ;;  %v1263_v13 = vld [vmem:[%s1453_s22 + $0x54] sm:$0xf0] }
  0x27   : > { %v1100_v20 = vor.u32 %v1263_v13, %v1099_v12 }
  0x29   : > { %622 = vmatpush.bf16.msra.mxu0 %v1284_v14  ;;  %1307 = vmatpush.bf16.msra.mxu2 %v1284_v14  ;;  %v1163_v14 = vld [vmem:[%s1453_s22 + $0xd0] sm:$0xf] }
  0x2a   : > { %711 = vmatpush.bf16.msra.mxu1 %v1292_v15  ;;  %1315 = vmatpush.bf16.msra.mxu3 %v1292_v15  ;;  %v1279_v15 = vld [vmem:[%s1453_s22 + $0xd4] sm:$0xf0] }
  0x2b   : > { %v1164_v21 = vor.u32 %v1279_v15, %v1163_v14 }
  0x2c   : > { %623 = vmatmul.bf16.vlgmr.msra.gmra.mxu0 %v1060_v24  ;;  %663 = vmatmul.bf16.vlgmr.msra.gmra.mxu2 %v1124_v25  ;;  %v1107_v24 = vld [vmem:[%s1453_s22 + $0x60] sm:$0xf]  ;;  %v1265_v25 = vld [vmem:[%s1453_s22 + $0x64] sm:$0xf0] }
  0x2d   : > { %712 = vmatmul.bf16.vlgmr.msra.gmra.mxu1 %v1064_v26  ;;  %752 = vmatmul.bf16.vlgmr.msra.gmra.mxu3 %v1128_v27  ;;  %v1171_v26 = vld [vmem:[%s1453_s22 + $0xe0] sm:$0xf]  ;;  %v1281_v27 = vld [vmem:[%s1453_s22 + $0xe4] sm:$0xf0]  ;;  %v1108_v32 = vor.u32 %v1265_v25, %v1107_v24 }
  0x2e   : > { %v1172_v33 = vor.u32 %v1281_v27, %v1171_v26 }
  0x3c   : > { %628 = vmatmul.bf16.gmra.mxu0 %v1068_v36  ;;  %668 = vmatmul.bf16.gmra.mxu2 %v1132_v37  ;;  %v1115_v36 = vld [vmem:[%s1453_s22 + $0x70] sm:$0xf]  ;;  %v1267_v37 = vld [vmem:[%s1453_s22 + $0x74] sm:$0xf0] }
  0x3d   : > { %717 = vmatmul.bf16.gmra.mxu1 %v1072_v38  ;;  %757 = vmatmul.bf16.gmra.mxu3 %v1136_v39  ;;  %v1179_v38 = vld [vmem:[%s1453_s22 + $0xf0] sm:$0xf]  ;;  %v1283_v39 = vld [vmem:[%s1453_s22 + $0xf4] sm:$0xf0]  ;;  %v1116_v44 = vor.u32 %v1267_v37, %v1115_v36 }
  0x3e   : > { %v1180_v45 = vor.u32 %v1283_v39, %v1179_v38 }
  0x4c   : > { %633 = vmatmul.bf16.gmra.mxu0 %v1076_v48  ;;  %673 = vmatmul.bf16.gmra.mxu2 %v1140_v49  ;;  %v1531_v49 = vld [vmem:[%s1615_s2] ss:$0 sm:$0xff] }
  0x4d   : > { %722 = vmatmul.bf16.gmra.mxu1 %v1080_v50  ;;  %762 = vmatmul.bf16.gmra.mxu3 %v1144_v51 }
  0x5c   : > { %638 = vmatmul.bf16.gmra.mxu0 %v1084_v60  ;;  %678 = vmatmul.bf16.gmra.mxu2 %v1148_v61 }
  0x5d   : > { %727 = vmatmul.bf16.gmra.mxu1 %v1088_v62  ;;  %767 = vmatmul.bf16.gmra.mxu3 %v1152_v63 }
  0x6c   : > { %643 = vmatmul.bf16.gmra.mxu0 %v1092_v8  ;;  %683 = vmatmul.bf16.gmra.mxu2 %v1156_v9 }
  0x6d   : > { %732 = vmatmul.bf16.gmra.mxu1 %v1096_v10  ;;  %772 = vmatmul.bf16.gmra.mxu3 %v1160_v11 }
  0x7c   : > { %648 = vmatmul.bf16.gmra.mxu0 %v1100_v20  ;;  %688 = vmatmul.bf16.gmra.mxu2 %v1164_v21 }
  0x7d   : > { %737 = vmatmul.bf16.gmra.mxu1 %v1104_v22  ;;  %777 = vmatmul.bf16.gmra.mxu3 %v1168_v23 }
  0x8c   : > { %653 = vmatmul.bf16.gmra.mxu0 %v1108_v32  ;;  %693 = vmatmul.bf16.gmra.mxu2 %v1172_v33 }
  0x8d   : > { %742 = vmatmul.bf16.gmra.mxu1 %v1112_v34  ;;  %782 = vmatmul.bf16.gmra.mxu3 %v1176_v35 }
  0x9c   : > { %658 = vmatmul.bf16.gmra.mxu0 %v1116_v44  ;;  %698 = vmatmul.bf16.gmra.mxu2 %v1180_v45 }
  0x9d   : > { %747 = vmatmul.bf16.gmra.mxu1 %v1120_v46  ;;  %787 = vmatmul.bf16.gmra.mxu3 %v1184_v47 }
  0xa9   : > { %v624_v48 = vpop.f32.mrf.mxu0 }
  0xaa   : > { %v713_v50 = vpop.f32.mrf.mxu1 }
  0xab   : > { %v714_v51 = vadd.f32 %v713_v50, %v624_v48 }
  0xad   : > { %v896_v52 = vadd.f32 %v1531_v49, %v714_v51 }
  0xaf   : > { %928 = vst [vmem:[%s1538_s7] sm:$0xff] %v896_v52  ;;  %v664_v53 = vpop.f32.mrf.mxu2 }
  0xb0   : > { %v753_v54 = vpop.f32.mrf.mxu3 }
  0xb1   : > { %v754_v55 = vadd.f32 %v753_v54, %v664_v53  ;;  %v626_v56 = vpop.f32.mrf.mxu0 }
  0xb2   : > { %v715_v57 = vpop.f32.mrf.mxu1 }
  0xb3   : > { %v912_v58 = vadd.f32 %v1531_v49, %v754_v55  ;;  %v716_v59 = vadd.f32 %v715_v57, %v626_v56 }
  0xb5   : > { %944 = vst [vmem:[%s1538_s7 + $0x80] sm:$0xff] %v912_v58  ;;  %v897_v60 = vadd.f32 %v1531_v49, %v716_v59 }
  0xb7   : > { %929 = vst [vmem:[%s1538_s7 + $0x8] sm:$0xff] %v897_v60  ;;  %v666_v61 = vpop.f32.mrf.mxu2 }
  0xb8   : > { %v755_v62 = vpop.f32.mrf.mxu3 }
  0xb9   : > { %v756_v63 = vadd.f32 %v755_v62, %v666_v61  ;;  %v629_v0 = vpop.f32.mrf.mxu0 }
  0xba   : > { %v718_v1 = vpop.f32.mrf.mxu1 }
  0xbb   : > { %v913_v2 = vadd.f32 %v1531_v49, %v756_v63  ;;  %v719_v3 = vadd.f32 %v718_v1, %v629_v0 }
  0xbd   : > { %945 = vst [vmem:[%s1538_s7 + $0x88] sm:$0xff] %v913_v2  ;;  %v898_v4 = vadd.f32 %v1531_v49, %v719_v3 }
  0xbf   : > { %930 = vst [vmem:[%s1538_s7 + $0x10] sm:$0xff] %v898_v4  ;;  %v669_v5 = vpop.f32.mrf.mxu2 }
  0xc0   : > { %v758_v6 = vpop.f32.mrf.mxu3 }
  0xc1   : > { %v759_v7 = vadd.f32 %v758_v6, %v669_v5  ;;  %v631_v8 = vpop.f32.mrf.mxu0 }
  0xc2   : > { %v720_v9 = vpop.f32.mrf.mxu1 }
  0xc3   : > { %v914_v10 = vadd.f32 %v1531_v49, %v759_v7  ;;  %v721_v11 = vadd.f32 %v720_v9, %v631_v8 }
  0xc5   : > { %946 = vst [vmem:[%s1538_s7 + $0x90] sm:$0xff] %v914_v10  ;;  %v899_v12 = vadd.f32 %v1531_v49, %v721_v11 }
  0xc7   : > { %931 = vst [vmem:[%s1538_s7 + $0x18] sm:$0xff] %v899_v12  ;;  %v671_v13 = vpop.f32.mrf.mxu2 }
  0xc8   : > { %v760_v14 = vpop.f32.mrf.mxu3 }
  0xc9   : > { %v761_v15 = vadd.f32 %v760_v14, %v671_v13  ;;  %v634_v16 = vpop.f32.mrf.mxu0 }
  0xca   : > { %v723_v17 = vpop.f32.mrf.mxu1 }
  0xcb   : > { %v915_v18 = vadd.f32 %v1531_v49, %v761_v15  ;;  %v724_v19 = vadd.f32 %v723_v17, %v634_v16 }
  0xcd   : > { %947 = vst [vmem:[%s1538_s7 + $0x98] sm:$0xff] %v915_v18  ;;  %v900_v20 = vadd.f32 %v1531_v49, %v724_v19 }
  0xcf   : > { %932 = vst [vmem:[%s1538_s7 + $0x20] sm:$0xff] %v900_v20  ;;  %v674_v21 = vpop.f32.mrf.mxu2 }
  0xd0   : > { %v763_v22 = vpop.f32.mrf.mxu3 }
  0xd1   : > { %v764_v23 = vadd.f32 %v763_v22, %v674_v21  ;;  %v636_v24 = vpop.f32.mrf.mxu0 }
  0xd2   : > { %v725_v25 = vpop.f32.mrf.mxu1 }
  0xd3   : > { %v916_v26 = vadd.f32 %v1531_v49, %v764_v23  ;;  %v726_v27 = vadd.f32 %v725_v25, %v636_v24 }
  0xd5   : > { %948 = vst [vmem:[%s1538_s7 + $0xa0] sm:$0xff] %v916_v26  ;;  %v901_v28 = vadd.f32 %v1531_v49, %v726_v27 }
  0xd7   : > { %933 = vst [vmem:[%s1538_s7 + $0x28] sm:$0xff] %v901_v28  ;;  %v676_v29 = vpop.f32.mrf.mxu2 }
  0xd8   : > { %v765_v30 = vpop.f32.mrf.mxu3 }
  0xd9   : > { %v766_v31 = vadd.f32 %v765_v30, %v676_v29  ;;  %v639_v32 = vpop.f32.mrf.mxu0 }
  0xda   : > { %v728_v33 = vpop.f32.mrf.mxu1 }
  0xdb   : > { %v917_v34 = vadd.f32 %v1531_v49, %v766_v31  ;;  %v729_v35 = vadd.f32 %v728_v33, %v639_v32 }
  0xdd   : > { %949 = vst [vmem:[%s1538_s7 + $0xa8] sm:$0xff] %v917_v34  ;;  %v902_v36 = vadd.f32 %v1531_v49, %v729_v35 }
  0xdf   : > { %934 = vst [vmem:[%s1538_s7 + $0x30] sm:$0xff] %v902_v36  ;;  %v679_v37 = vpop.f32.mrf.mxu2 }
  0xe0   : > { %v768_v38 = vpop.f32.mrf.mxu3 }
  0xe1   : > { %v769_v39 = vadd.f32 %v768_v38, %v679_v37  ;;  %v641_v40 = vpop.f32.mrf.mxu0 }
  0xe2   : > { %v730_v41 = vpop.f32.mrf.mxu1 }
  0xe3   : > { %v918_v42 = vadd.f32 %v1531_v49, %v769_v39  ;;  %v731_v43 = vadd.f32 %v730_v41, %v641_v40 }
  0xe5   : > { %950 = vst [vmem:[%s1538_s7 + $0xb0] sm:$0xff] %v918_v42  ;;  %v903_v44 = vadd.f32 %v1531_v49, %v731_v43 }
  0xe7   : > { %935 = vst [vmem:[%s1538_s7 + $0x38] sm:$0xff] %v903_v44  ;;  %v681_v45 = vpop.f32.mrf.mxu2 }
  0xe8   : > { %v770_v46 = vpop.f32.mrf.mxu3 }
  0xe9   : > { %v771_v47 = vadd.f32 %v770_v46, %v681_v45  ;;  %v644_v48 = vpop.f32.mrf.mxu0 }
  0xea   : > { %v733_v50 = vpop.f32.mrf.mxu1 }
  0xeb   : > { %v919_v51 = vadd.f32 %v1531_v49, %v771_v47  ;;  %v734_v52 = vadd.f32 %v733_v50, %v644_v48 }
  0xed   : > { %951 = vst [vmem:[%s1538_s7 + $0xb8] sm:$0xff] %v919_v51  ;;  %v904_v53 = vadd.f32 %v1531_v49, %v734_v52 }
  0xef   : > { %936 = vst [vmem:[%s1538_s7 + $0x40] sm:$0xff] %v904_v53  ;;  %v684_v54 = vpop.f32.mrf.mxu2 }
  0xf0   : > { %v773_v55 = vpop.f32.mrf.mxu3 }
  0xf1   : > { %v774_v56 = vadd.f32 %v773_v55, %v684_v54  ;;  %v646_v57 = vpop.f32.mrf.mxu0 }
  0xf2   : > { %v735_v58 = vpop.f32.mrf.mxu1 }
  0xf3   : > { %v920_v59 = vadd.f32 %v1531_v49, %v774_v56  ;;  %v736_v60 = vadd.f32 %v735_v58, %v646_v57 }
  0xf5   : > { %952 = vst [vmem:[%s1538_s7 + $0xc0] sm:$0xff] %v920_v59  ;;  %v905_v61 = vadd.f32 %v1531_v49, %v736_v60 }
  0xf7   : > { %937 = vst [vmem:[%s1538_s7 + $0x48] sm:$0xff] %v905_v61  ;;  %v686_v62 = vpop.f32.mrf.mxu2 }
  0xf8   : > { %v775_v63 = vpop.f32.mrf.mxu3 }
  0xf9   : > { %v776_v0 = vadd.f32 %v775_v63, %v686_v62  ;;  %v649_v1 = vpop.f32.mrf.mxu0 }
  0xfa   : > { %v738_v2 = vpop.f32.mrf.mxu1 }
  0xfb   : > { %v921_v3 = vadd.f32 %v1531_v49, %v776_v0  ;;  %v739_v4 = vadd.f32 %v738_v2, %v649_v1 }
  0xfd   : > { %953 = vst [vmem:[%s1538_s7 + $0xc8] sm:$0xff] %v921_v3  ;;  %v906_v5 = vadd.f32 %v1531_v49, %v739_v4 }
  0xff   : > { %938 = vst [vmem:[%s1538_s7 + $0x50] sm:$0xff] %v906_v5  ;;  %v689_v6 = vpop.f32.mrf.mxu2 }
 0x100   : > { %v778_v7 = vpop.f32.mrf.mxu3 }
 0x101   : > { %v779_v8 = vadd.f32 %v778_v7, %v689_v6  ;;  %v651_v9 = vpop.f32.mrf.mxu0 }
 0x102   : > { %v740_v10 = vpop.f32.mrf.mxu1 }
 0x103   : > { %v922_v11 = vadd.f32 %v1531_v49, %v779_v8  ;;  %v741_v12 = vadd.f32 %v740_v10, %v651_v9 }
 0x105   : > { %954 = vst [vmem:[%s1538_s7 + $0xd0] sm:$0xff] %v922_v11  ;;  %v907_v13 = vadd.f32 %v1531_v49, %v741_v12 }
 0x107   : > { %939 = vst [vmem:[%s1538_s7 + $0x58] sm:$0xff] %v907_v13  ;;  %v691_v14 = vpop.f32.mrf.mxu2 }
 0x108   : > { %v780_v15 = vpop.f32.mrf.mxu3 }
 0x109   : > { %v781_v16 = vadd.f32 %v780_v15, %v691_v14  ;;  %v654_v17 = vpop.f32.mrf.mxu0 }
 0x10a   : > { %v743_v18 = vpop.f32.mrf.mxu1 }
 0x10b   : > { %v923_v19 = vadd.f32 %v1531_v49, %v781_v16  ;;  %v744_v20 = vadd.f32 %v743_v18, %v654_v17 }
 0x10d   : > { %955 = vst [vmem:[%s1538_s7 + $0xd8] sm:$0xff] %v923_v19  ;;  %v908_v21 = vadd.f32 %v1531_v49, %v744_v20 }
 0x10f   : > { %940 = vst [vmem:[%s1538_s7 + $0x60] sm:$0xff] %v908_v21  ;;  %v694_v22 = vpop.f32.mrf.mxu2 }
 0x110   : > { %v783_v23 = vpop.f32.mrf.mxu3 }
 0x111   : > { %v784_v24 = vadd.f32 %v783_v23, %v694_v22  ;;  %v656_v25 = vpop.f32.mrf.mxu0 }
 0x112   : > { %v745_v26 = vpop.f32.mrf.mxu1 }
 0x113   : > { %v924_v27 = vadd.f32 %v1531_v49, %v784_v24  ;;  %v746_v28 = vadd.f32 %v745_v26, %v656_v25 }
 0x115   : > { %956 = vst [vmem:[%s1538_s7 + $0xe0] sm:$0xff] %v924_v27  ;;  %v909_v29 = vadd.f32 %v1531_v49, %v746_v28 }
 0x117   : > { %941 = vst [vmem:[%s1538_s7 + $0x68] sm:$0xff] %v909_v29  ;;  %v696_v30 = vpop.f32.mrf.mxu2 }
 0x118   : > { %v785_v31 = vpop.f32.mrf.mxu3 }
 0x119   : > { %v786_v32 = vadd.f32 %v785_v31, %v696_v30  ;;  %v659_v33 = vpop.f32.mrf.mxu0 }
 0x11a   : > { %v748_v34 = vpop.f32.mrf.mxu1 }
 0x11b   : > { %v925_v35 = vadd.f32 %v1531_v49, %v786_v32  ;;  %v749_v36 = vadd.f32 %v748_v34, %v659_v33 }
 0x11d   : > { %957 = vst [vmem:[%s1538_s7 + $0xe8] sm:$0xff] %v925_v35  ;;  %v910_v37 = vadd.f32 %v1531_v49, %v749_v36 }
 0x11f   : > { %942 = vst [vmem:[%s1538_s7 + $0x70] sm:$0xff] %v910_v37  ;;  %v699_v38 = vpop.f32.mrf.mxu2 }
 0x120   : > { %v788_v39 = vpop.f32.mrf.mxu3 }
 0x121   : > { %v789_v40 = vadd.f32 %v788_v39, %v699_v38  ;;  %v661_v41 = vpop.f32.mrf.mxu0 }
 0x122   : > { %v750_v42 = vpop.f32.mrf.mxu1 }
 0x123   : > { %v926_v43 = vadd.f32 %v1531_v49, %v789_v40  ;;  %v751_v44 = vadd.f32 %v750_v42, %v661_v41 }
 0x125   : > { %958 = vst [vmem:[%s1538_s7 + $0xf0] sm:$0xff] %v926_v43  ;;  %v911_v45 = vadd.f32 %v1531_v49, %v751_v44 }
 0x127   : > { %943 = vst [vmem:[%s1538_s7 + $0x78] sm:$0xff] %v911_v45  ;;  %v701_v46 = vpop.f32.mrf.mxu2 }
 0x128   : > { %v790_v47 = vpop.f32.mrf.mxu3 }
 0x129   : > { %v791_v48 = vadd.f32 %v790_v47, %v701_v46 }
 0x12b   : > { %v927_v50 = vadd.f32 %v1531_v49, %v791_v48 }
 0x12d   : > { %959 = vst [vmem:[%s1538_s7 + $0xf8] sm:$0xff] %v927_v50 }
 0x12e PF: > { %s13_s14 = sadd.s32 1, %s1363_s14   ;;  %s1617_s12 = smov %s1359_s13 }
 0x12f   : > { %p10_p5 = scmp.ge.s32.totalorder %s13_s14, 4   ;;  %s1618_s13 = smov %s1620_s15 }
 0x131   :  { %12 = sbr.rel (!%p10_p5) target bundleno = 2 (0x2), region = 73 }

// kernel: discriminator_forward.5
= control target key start
LH: loop header
LB: loop body
LE: loop exit
PB: predicated region body
PF: predicated region fallthrough
CT: control target
= control target key end

     0   :  { %s608_s1 = inlined_call_operand.vmem [shape: bf16[128,128], index: 1, kind: input, shape index: {}]   ;;  %s609_s2 = inlined_call_operand.vmem [shape: f32[1,128], index: 2, kind: input, shape index: {}]   ;;  %s610_s0 = inlined_call_operand.vmem [shape: bf16[128,128], index: 0, kind: input, shape index: {}]   ;;  %s611_s3 = inlined_call_operand.vmem [shape: f32[128,128], index: 3, kind: output, shape index: {}]  }
   0x1   :  { %v445_v0 = vld [vmem:[%s608_s1 + $0x38] sm:$0xff]  ;;  %v444_v1 = vld [vmem:[%s608_s1 + $0x30] sm:$0xff]  ;;  %v443_v2 = vld [vmem:[%s608_s1 + $0x28] sm:$0xff] }
   0x2   :  { %178 = vmatpush.bf16.msra.mxu0 %v445_v0  ;;  %446 = vmatpush.bf16.msra.mxu1 %v445_v0  ;;  %v442_v3 = vld [vmem:[%s608_s1 + $0x20] sm:$0xff]  ;;  %v441_v4 = vld [vmem:[%s608_s1 + $0x18] sm:$0xff]  ;;  %v440_v5 = vld [vmem:[%s608_s1 + $0x10] sm:$0xff] }
   0x3   :  { %447 = vmatpush.bf16.msra.mxu2 %v445_v0  ;;  %448 = vmatpush.bf16.msra.mxu3 %v445_v0  ;;  %v439_v6 = vld [vmem:[%s608_s1 + $0x8] sm:$0xff]  ;;  %v438_v7 = vld [vmem:[%s608_s1] sm:$0xff]  ;;  %v432_v9 = vld [vmem:[%s610_s0 + $0x10] sm:$0xff] }
   0x4   :  { %v430_v8 = vld [vmem:[%s610_s0] sm:$0xff]  ;;  %v436_v11 = vld [vmem:[%s610_s0 + $0x30] sm:$0xff]  ;;  %v431_v12 = vld [vmem:[%s610_s0 + $0x8] sm:$0xff] }
   0x5   :  { %v434_v10 = vld [vmem:[%s610_s0 + $0x20] sm:$0xff]  ;;  %v433_v13 = vld [vmem:[%s610_s0 + $0x18] sm:$0xff]  ;;  %v435_v14 = vld [vmem:[%s610_s0 + $0x28] sm:$0xff] }
   0x6   :  { %179 = vmatpush.bf16.msra.mxu0 %v444_v1  ;;  %449 = vmatpush.bf16.msra.mxu1 %v444_v1  ;;  %v437_v15 = vld [vmem:[%s610_s0 + $0x38] sm:$0xff]  ;;  %v542_v16 = vld [vmem:[%s609_s2] ss:$0 sm:$0xff] }
   0x7   :  { %450 = vmatpush.bf16.msra.mxu2 %v444_v1  ;;  %451 = vmatpush.bf16.msra.mxu3 %v444_v1 }
   0xa   :  { %180 = vmatpush.bf16.msra.mxu0 %v443_v2  ;;  %452 = vmatpush.bf16.msra.mxu1 %v443_v2 }
   0xb   :  { %453 = vmatpush.bf16.msra.mxu2 %v443_v2  ;;  %454 = vmatpush.bf16.msra.mxu3 %v443_v2 }
   0xe   :  { %181 = vmatpush.bf16.msra.mxu0 %v442_v3  ;;  %455 = vmatpush.bf16.msra.mxu1 %v442_v3 }
   0xf   :  { %456 = vmatpush.bf16.msra.mxu2 %v442_v3  ;;  %457 = vmatpush.bf16.msra.mxu3 %v442_v3 }
  0x12   :  { %182 = vmatpush.bf16.msra.mxu0 %v441_v4  ;;  %458 = vmatpush.bf16.msra.mxu1 %v441_v4 }
  0x13   :  { %459 = vmatpush.bf16.msra.mxu2 %v441_v4  ;;  %460 = vmatpush.bf16.msra.mxu3 %v441_v4 }
  0x16   :  { %183 = vmatpush.bf16.msra.mxu0 %v440_v5  ;;  %461 = vmatpush.bf16.msra.mxu1 %v440_v5 }
  0x17   :  { %462 = vmatpush.bf16.msra.mxu2 %v440_v5  ;;  %463 = vmatpush.bf16.msra.mxu3 %v440_v5 }
  0x1a   :  { %184 = vmatpush.bf16.msra.mxu0 %v439_v6  ;;  %464 = vmatpush.bf16.msra.mxu1 %v439_v6 }
  0x1b   :  { %465 = vmatpush.bf16.msra.mxu2 %v439_v6  ;;  %466 = vmatpush.bf16.msra.mxu3 %v439_v6 }
  0x1e   :  { %185 = vmatpush.bf16.msra.mxu0 %v438_v7  ;;  %467 = vmatpush.bf16.msra.mxu1 %v438_v7 }
  0x1f   :  { %468 = vmatpush.bf16.msra.mxu2 %v438_v7  ;;  %469 = vmatpush.bf16.msra.mxu3 %v438_v7 }
  0x21   :  { %186 = vmatmul.bf16.vlgmr.msra.gmra.mxu0 %v430_v8  ;;  %196 = vmatmul.bf16.vlgmr.msra.gmra.mxu1 %v432_v9 }
  0x22   :  { %206 = vmatmul.bf16.vlgmr.msra.gmra.mxu2 %v434_v10  ;;  %216 = vmatmul.bf16.vlgmr.msra.gmra.mxu3 %v436_v11 }
  0x31   :  { %191 = vmatmul.bf16.gmra.mxu0 %v431_v12  ;;  %201 = vmatmul.bf16.gmra.mxu1 %v433_v13 }
  0x32   :  { %211 = vmatmul.bf16.gmra.mxu2 %v435_v14  ;;  %221 = vmatmul.bf16.gmra.mxu3 %v437_v15 }
  0x9e   :  { %v187_v17 = vpop.f32.mrf.mxu0  ;;  %v197_v18 = vpop.f32.mrf.mxu1 }
  0x9f   :  { %v282_v19 = vadd.f32 %v542_v16, %v187_v17  ;;  %v286_v20 = vadd.f32 %v542_v16, %v197_v18 }
  0xa1   :  { %vm298_vm0 = vcmp.gt.f32.partialorder %v282_v19, 0.0  ;;  %v314_v21 = vmul.f32 0.2, %v282_v19  ;;  %vm302_vm1 = vcmp.gt.f32.partialorder %v286_v20, 0.0  ;;  %v318_v22 = vmul.f32 0.2, %v286_v20 }
  0xa3   :  { %v330_v23 = vsel %vm298_vm0, %v282_v19, %v314_v21  ;;  %v334_v24 = vsel %vm302_vm1, %v286_v20, %v318_v22 }
  0xa4   :  { %346 = vst [vmem:[%s611_s3] sm:$0xff] %v330_v23 }
  0xa5   :  { %350 = vst [vmem:[%s611_s3 + $0x20] sm:$0xff] %v334_v24  ;;  %v207_v25 = vpop.f32.mrf.mxu2  ;;  %v217_v26 = vpop.f32.mrf.mxu3 }
  0xa6   :  { %v290_v27 = vadd.f32 %v542_v16, %v207_v25  ;;  %v294_v28 = vadd.f32 %v542_v16, %v217_v26  ;;  %v189_v29 = vpop.f32.mrf.mxu0  ;;  %v199_v30 = vpop.f32.mrf.mxu1 }
  0xa7   :  { %v283_v31 = vadd.f32 %v542_v16, %v189_v29  ;;  %v287_v32 = vadd.f32 %v542_v16, %v199_v30 }
  0xa8   :  { %vm306_vm2 = vcmp.gt.f32.partialorder %v290_v27, 0.0  ;;  %v322_v33 = vmul.f32 0.2, %v290_v27  ;;  %vm310_vm3 = vcmp.gt.f32.partialorder %v294_v28, 0.0  ;;  %v326_v34 = vmul.f32 0.2, %v294_v28 }
  0xa9   :  { %vm299_vm4 = vcmp.gt.f32.partialorder %v283_v31, 0.0  ;;  %v315_v35 = vmul.f32 0.2, %v283_v31  ;;  %vm303_vm5 = vcmp.gt.f32.partialorder %v287_v32, 0.0  ;;  %v319_v36 = vmul.f32 0.2, %v287_v32 }
  0xaa   :  { %v338_v37 = vsel %vm306_vm2, %v290_v27, %v322_v33  ;;  %v342_v38 = vsel %vm310_vm3, %v294_v28, %v326_v34 }
  0xab   :  { %354 = vst [vmem:[%s611_s3 + $0x40] sm:$0xff] %v338_v37  ;;  %v331_v39 = vsel %vm299_vm4, %v283_v31, %v315_v35  ;;  %v335_v40 = vsel %vm303_vm5, %v287_v32, %v319_v36 }
  0xac   :  { %358 = vst [vmem:[%s611_s3 + $0x60] sm:$0xff] %v342_v38 }
  0xad   :  { %347 = vst [vmem:[%s611_s3 + $0x8] sm:$0xff] %v331_v39  ;;  %v209_v41 = vpop.f32.mrf.mxu2  ;;  %v219_v42 = vpop.f32.mrf.mxu3 }
  0xae   :  { %351 = vst [vmem:[%s611_s3 + $0x28] sm:$0xff] %v335_v40  ;;  %v291_v43 = vadd.f32 %v542_v16, %v209_v41  ;;  %v295_v44 = vadd.f32 %v542_v16, %v219_v42  ;;  %v192_v45 = vpop.f32.mrf.mxu0  ;;  %v202_v46 = vpop.f32.mrf.mxu1 }
  0xaf   :  { %v284_v47 = vadd.f32 %v542_v16, %v192_v45  ;;  %v288_v48 = vadd.f32 %v542_v16, %v202_v46 }
  0xb0   :  { %vm307_vm6 = vcmp.gt.f32.partialorder %v291_v43, 0.0  ;;  %v323_v49 = vmul.f32 0.2, %v291_v43  ;;  %vm311_vm7 = vcmp.gt.f32.partialorder %v295_v44, 0.0  ;;  %v327_v50 = vmul.f32 0.2, %v295_v44 }
  0xb1   :  { %vm300_vm8 = vcmp.gt.f32.partialorder %v284_v47, 0.0  ;;  %v316_v51 = vmul.f32 0.2, %v284_v47  ;;  %vm304_vm9 = vcmp.gt.f32.partialorder %v288_v48, 0.0  ;;  %v320_v52 = vmul.f32 0.2, %v288_v48 }
  0xb2   :  { %v339_v53 = vsel %vm307_vm6, %v291_v43, %v323_v49  ;;  %v343_v54 = vsel %vm311_vm7, %v295_v44, %v327_v50 }
  0xb3   :  { %355 = vst [vmem:[%s611_s3 + $0x48] sm:$0xff] %v339_v53  ;;  %v332_v55 = vsel %vm300_vm8, %v284_v47, %v316_v51  ;;  %v336_v56 = vsel %vm304_vm9, %v288_v48, %v320_v52 }
  0xb4   :  { %359 = vst [vmem:[%s611_s3 + $0x68] sm:$0xff] %v343_v54 }
  0xb5   :  { %348 = vst [vmem:[%s611_s3 + $0x10] sm:$0xff] %v332_v55  ;;  %v212_v57 = vpop.f32.mrf.mxu2  ;;  %v222_v58 = vpop.f32.mrf.mxu3 }
  0xb6   :  { %352 = vst [vmem:[%s611_s3 + $0x30] sm:$0xff] %v336_v56  ;;  %v292_v59 = vadd.f32 %v542_v16, %v212_v57  ;;  %v296_v60 = vadd.f32 %v542_v16, %v222_v58  ;;  %v194_v61 = vpop.f32.mrf.mxu0  ;;  %v204_v62 = vpop.f32.mrf.mxu1 }
  0xb7   :  { %v285_v63 = vadd.f32 %v542_v16, %v194_v61  ;;  %v289_v0 = vadd.f32 %v542_v16, %v204_v62 }
  0xb8   :  { %vm308_vm10 = vcmp.gt.f32.partialorder %v292_v59, 0.0  ;;  %v324_v1 = vmul.f32 0.2, %v292_v59  ;;  %vm312_vm11 = vcmp.gt.f32.partialorder %v296_v60, 0.0  ;;  %v328_v2 = vmul.f32 0.2, %v296_v60 }
  0xb9   :  { %vm301_vm12 = vcmp.gt.f32.partialorder %v285_v63, 0.0  ;;  %v317_v3 = vmul.f32 0.2, %v285_v63  ;;  %vm305_vm13 = vcmp.gt.f32.partialorder %v289_v0, 0.0  ;;  %v321_v4 = vmul.f32 0.2, %v289_v0 }
  0xba   :  { %v340_v5 = vsel %vm308_vm10, %v292_v59, %v324_v1  ;;  %v344_v6 = vsel %vm312_vm11, %v296_v60, %v328_v2 }
  0xbb   :  { %356 = vst [vmem:[%s611_s3 + $0x50] sm:$0xff] %v340_v5  ;;  %v333_v7 = vsel %vm301_vm12, %v285_v63, %v317_v3  ;;  %v337_v8 = vsel %vm305_vm13, %v289_v0, %v321_v4 }
  0xbc   :  { %360 = vst [vmem:[%s611_s3 + $0x70] sm:$0xff] %v344_v6 }
  0xbd   :  { %349 = vst [vmem:[%s611_s3 + $0x18] sm:$0xff] %v333_v7  ;;  %v214_v9 = vpop.f32.mrf.mxu2  ;;  %v224_v10 = vpop.f32.mrf.mxu3 }
  0xbe   :  { %353 = vst [vmem:[%s611_s3 + $0x38] sm:$0xff] %v337_v8  ;;  %v293_v11 = vadd.f32 %v542_v16, %v214_v9  ;;  %v297_v12 = vadd.f32 %v542_v16, %v224_v10 }
  0xc0   :  { %vm309_vm14 = vcmp.gt.f32.partialorder %v293_v11, 0.0  ;;  %v325_v13 = vmul.f32 0.2, %v293_v11  ;;  %vm313_vm15 = vcmp.gt.f32.partialorder %v297_v12, 0.0  ;;  %v329_v14 = vmul.f32 0.2, %v297_v12 }
  0xc2   :  { %v341_v15 = vsel %vm309_vm14, %v293_v11, %v325_v13  ;;  %v345_v17 = vsel %vm313_vm15, %v297_v12, %v329_v14 }
  0xc3   :  { %357 = vst [vmem:[%s611_s3 + $0x58] sm:$0xff] %v341_v15 }
  0xc4   :  { %361 = vst [vmem:[%s611_s3 + $0x78] sm:$0xff] %v345_v17 }

// kernel: discriminator_forward.6
= control target key start
LH: loop header
LB: loop body
LE: loop exit
PB: predicated region body
PF: predicated region fallthrough
CT: control target
= control target key end

     0   :  { %s724_s12 = smov 0   ;;  %s726_s13 = smov 0   ;;  %s815_s0 = inlined_call_operand.vmem [shape: bf16[2,16,256], index: 0, kind: input, shape index: {}]   ;;  %s816_s1 = inlined_call_operand.vmem [shape: bf16[256,128], index: 1, kind: input, shape index: {}]   ;;  %s817_s2 = inlined_call_operand.vmem [shape: f32[1,128], index: 2, kind: input, shape index: {}]   ;;  %s818_s3 = inlined_call_operand.vmem [shape: f32[2,16,128], index: 3, kind: output, shape index: {}]  }
   0x1   :  { %s728_s14 = smov 0  }
   0x2 LB: > { %s25_s15 = sadd.s32 1, %s697_s13  ;;  %p550_p0 = scmp.ge.s32.totalorder %s701_s14, 1  ;;  %s701_s14 = sphi %s728_s14, %s13_s14   ;;  %s697_s13 = sphi %s726_s13, %s820_s13   ;;  %s693_s12 = sphi %s724_s12, %s819_s12  }
   0x3   : > { %p27_p1 = scmp.ge.s32.totalorder %s25_s15, 2  ;;  %p167_p2 = scmp.lt.s32.totalorder %s701_s14, 3 }
   0x5   : > { %s822_s15 = smov (%p27_p1, %s25_s15), 0  ;;  %p168_p3 = pnand %p550_p0, %p167_p2 }
   0x6   : > { %p201_p4 = scmp.lt.s32.totalorder (!%p168_p3), %s693_s12, 1 }
   0x7   : > { %171 = sbr.rel (%p168_p3) target bundleno = 246 (0xf6), region = 32 }
   0xc   : > { %v640_v0 = vld [vmem:[%s816_s1 + $0x38] sm:$0xff]  ;;  %v639_v2 = vld [vmem:[%s816_s1 + $0x30] sm:$0xff]  ;;  %v638_v4 = vld [vmem:[%s816_s1 + $0x28] sm:$0xff]  ;;  %s824_s12 = smov (!%p201_p4, %s693_s12), 1  ;;  %v703_v22 = vmov 16.0  }
   0xd   : > { %v648_v1 = vld [vmem:[%s816_s1 + $0x78] sm:$0xff]  ;;  %369 = vmatpush.bf16.msra.mxu0 %v640_v0  ;;  %v647_v3 = vld [vmem:[%s816_s1 + $0x70] sm:$0xff]  ;;  %v646_v5 = vld [vmem:[%s816_s1 + $0x68] sm:$0xff]  ;;  %s629_s17 = sshll.u32 %s824_s12, 4  ;;  %675 = vrcp.f32 %v703_v22 }
   0xe   : > { %383 = vmatpush.bf16.msra.mxu1 %v648_v1  ;;  %v637_v6 = vld [vmem:[%s816_s1 + $0x20] sm:$0xff]  ;;  %v636_v8 = vld [vmem:[%s816_s1 + $0x18] sm:$0xff]  ;;  %v635_v10 = vld [vmem:[%s816_s1 + $0x10] sm:$0xff]  ;;  %s208_s24 = scalar_lea.vmem %s815_s0, %s629_s17  ;;  %s220_s6 = scalar_lea.vmem %s818_s3, %s629_s17 }
   0xf   : > { %v645_v7 = vld [vmem:[%s816_s1 + $0x60] sm:$0xff]  ;;  %v644_v9 = vld [vmem:[%s816_s1 + $0x58] sm:$0xff]  ;;  %v643_v11 = vld [vmem:[%s816_s1 + $0x50] sm:$0xff] }
  0x10   : > { %v634_v12 = vld [vmem:[%s816_s1 + $0x8] sm:$0xff]  ;;  %v633_v14 = vld [vmem:[%s816_s1] sm:$0xff] }
  0x11   : > { %370 = vmatpush.bf16.msra.mxu0 %v639_v2  ;;  %v642_v13 = vld [vmem:[%s816_s1 + $0x48] sm:$0xff]  ;;  %v641_v15 = vld [vmem:[%s816_s1 + $0x40] sm:$0xff] }
  0x12   : > { %384 = vmatpush.bf16.msra.mxu1 %v647_v3  ;;  %v557_v16 = vld [vmem:[%s208_s24] sm:$0xf]  ;;  %v632_v17 = vld [vmem:[%s208_s24 + $0x4] sm:$0xf0]  ;;  %v631_v18 = vld [vmem:[%s208_s24 + $0x4] sm:$0xf] }
  0x13   : > { %v559_v19 = vld [vmem:[%s208_s24 + $0x8] sm:$0xf0]  ;;  %v558_v20 = vor.u32 %v632_v17, %v557_v16  ;;  %v676_v25 = vpop.eup %675  ;;  %v674_v27 = vld [vmem:[%s817_s2] ss:$0 sm:$0xff] }
  0x14   : > { %v562_v21 = vor.u32 %v631_v18, %v559_v19  ;;  %v420_v30 = vmul.f32 16.0, %v676_v25  ;;  %vm424_vm0 = vweird.f32 %v676_v25 }
  0x15   : > { %371 = vmatpush.bf16.msra.mxu0 %v638_v4 }
  0x16   : > { %385 = vmatpush.bf16.msra.mxu1 %v646_v5  ;;  %v421_v34 = vsub.f32 1.0, %v420_v30 }
  0x18   : > { %v422_v37 = vmul.f32 %v676_v25, %v421_v34 }
  0x19   : > { %372 = vmatpush.bf16.msra.mxu0 %v637_v6 }
  0x1a   : > { %386 = vmatpush.bf16.msra.mxu1 %v645_v7  ;;  %v423_v40 = vadd.f32 %v676_v25, %v422_v37 }
  0x1c   : > { %v425_v43 = vsel %vm424_vm0, %v676_v25, %v423_v40 }
  0x1d   : > { %373 = vmatpush.bf16.msra.mxu0 %v636_v8 }
  0x1e   : > { %387 = vmatpush.bf16.msra.mxu1 %v644_v9 }
  0x21   : > { %374 = vmatpush.bf16.msra.mxu0 %v635_v10 }
  0x22   : > { %388 = vmatpush.bf16.msra.mxu1 %v643_v11 }
  0x25   : > { %375 = vmatpush.bf16.msra.mxu0 %v634_v12 }
  0x26   : > { %389 = vmatpush.bf16.msra.mxu1 %v642_v13 }
  0x29   : > { %376 = vmatpush.bf16.msra.mxu0 %v633_v14 }
  0x2a   : > { %390 = vmatpush.bf16.msra.mxu1 %v641_v15 }
  0x2c   : > { %377 = vmatmul.bf16.vlgmr.msra.gmra.mxu0 %v558_v20 }
  0x2d   : > { %391 = vmatmul.bf16.vlgmr.msra.gmra.mxu1 %v562_v21 }
  0xa9   : > { %v378_v23 = vpop.f32.mrf.mxu0 }
  0xaa   : > { %v392_v24 = vpop.f32.mrf.mxu1 }
  0xab   : > { %v393_v26 = vadd.f32 %v392_v24, %v378_v23 }
  0xad   : > { %v410_v32 = vadd.f32 %v674_v27, %v393_v26 }
  0xb1   : > { %v380_v28 = vpop.f32.mrf.mxu0 }
  0xb2   : > { %v394_v29 = vpop.f32.mrf.mxu1 }
  0xb3   : > { %v395_v31 = vadd.f32 %v394_v29, %v380_v28 }
  0xb5   : > { %v411_v33 = vadd.f32 %v674_v27, %v395_v31 }
  0xb7   : > { %v412_v35 = vadd.f32 %v411_v33, %v410_v32 }
  0xb9   : > { %v413_v36 = vrot.slane %v412_v35, 4 }
  0xbb   : > { %v414_v38 = vadd.f32 %v413_v36, %v412_v35 }
  0xbd   : > { %v415_v39 = vrot.slane %v414_v38, 2 }
  0xbf   : > { %v416_v41 = vadd.f32 %v415_v39, %v414_v38 }
  0xc1   : > { %v417_v42 = vrot.slane %v416_v41, 1 }
  0xc3   : > { %v418_v44 = vadd.f32 %v417_v42, %v416_v41 }
  0xc5   : > { %v426_v45 = vmul.f32 %v425_v43, %v418_v44 }
  0xc7   : > { %v427_v46 = vsub.f32 %v410_v32, %v426_v45  ;;  %v428_v47 = vsub.f32 %v411_v33, %v426_v45 }
  0xc9   : > { %v429_v48 = vmul.f32 %v427_v46, %v427_v46  ;;  %v430_v49 = vmul.f32 %v428_v47, %v428_v47 }
  0xcb   : > { %v431_v50 = vadd.f32 %v430_v49, %v429_v48 }
  0xcd   : > { %v432_v51 = vrot.slane %v431_v50, 4 }
  0xcf   : > { %v433_v52 = vadd.f32 %v432_v51, %v431_v50 }
  0xd1   : > { %v434_v53 = vrot.slane %v433_v52, 2 }
  0xd3   : > { %v435_v54 = vadd.f32 %v434_v53, %v433_v52 }
  0xd5   : > { %v436_v55 = vrot.slane %v435_v54, 1 }
  0xd7   : > { %v437_v56 = vadd.f32 %v436_v55, %v435_v54 }
  0xd9   : > { %v438_v57 = vmul.f32 %v437_v56, %v425_v43 }
  0xdb   : > { %v439_v58 = vadd.f32 1e-05, %v438_v57 }
  0xdd   : > { %677 = vrsqrt.f32 %v439_v58  ;;  %vm446_vm2 = vweird.f32 %v439_v58 }
  0xe3   : > { %v678_v59 = vpop.eup %677 }
  0xe4   : > { %v441_v60 = vmul.f32 %v678_v59, %v439_v58  ;;  %vm447_vm1 = vweird.f32 %v678_v59 }
  0xe5   : > { %vm448_vm3 = vmor %vm446_vm2, %vm447_vm1 }
  0xe6   : > { %v442_v61 = vmul.f32 %v678_v59, %v441_v60 }
  0xe8   : > { %v443_v62 = vmul.f32 0.5, %v442_v61 }
  0xea   : > { %v444_v63 = vsub.f32 1.5, %v443_v62 }
  0xec   : > { %v445_v0 = vmul.f32 %v678_v59, %v444_v63 }
  0xee   : > { %v449_v1 = vsel %vm448_vm3, %v678_v59, %v445_v0 }
  0xef   : > { %v450_v2 = vmul.f32 %v449_v1, %v427_v46  ;;  %v451_v3 = vmul.f32 %v449_v1, %v428_v47 }
  0xf1   : > { %vm452_vm4 = vcmp.gt.f32.partialorder %v450_v2, 0.0  ;;  %vm453_vm5 = vcmp.gt.f32.partialorder %v451_v3, 0.0  ;;  %v454_v4 = vmul.f32 0.2, %v450_v2  ;;  %v455_v5 = vmul.f32 0.2, %v451_v3 }
  0xf3   : > { %v456_v6 = vsel %vm452_vm4, %v450_v2, %v454_v4  ;;  %v457_v7 = vsel %vm453_vm5, %v451_v3, %v455_v5 }
  0xf4   : > { %458 = vst [vmem:[%s220_s6] sm:$0xff] %v456_v6 }
  0xf5   : > { %459 = vst [vmem:[%s220_s6 + $0x8] sm:$0xff] %v457_v7 }
  0xf6 PF: > { %s13_s14 = sadd.s32 1, %s701_s14   ;;  %s819_s12 = smov %s697_s13 }
  0xf7   : > { %p10_p5 = scmp.ge.s32.totalorder %s13_s14, 4   ;;  %s820_s13 = smov %s822_s15 }
  0xf9   :  { %12 = sbr.rel (!%p10_p5) target bundleno = 2 (0x2), region = 73 }

// kernel: discriminator_forward.7
= control target key start
LH: loop header
LB: loop body
LE: loop exit
PB: predicated region body
PF: predicated region fallthrough
CT: control target
= control target key end

     0   :  { %s1034_s18 = smov 0   ;;  %s1036_s19 = smov 0   ;;  %s1223_s0 = inlined_call_operand.vmem [shape: bf16[2,4,512], index: 0, kind: input, shape index: {}]   ;;  %s1224_s1 = inlined_call_operand.vmem [shape: bf16[512,128], index: 1, kind: input, shape index: {}]   ;;  %s1225_s2 = inlined_call_operand.vmem [shape: f32[1,128], index: 2, kind: input, shape index: {}]   ;;  %s1226_s3 = inlined_call_operand.vmem [shape: f32[128,128], index: 3, kind: input, shape index: {}]   ;;  %s1227_s4 = inlined_call_operand.vmem [shape: f32[1,128], index: 4, kind: input, shape index: {}]   ;;  %s1228_s5 = inlined_call_operand.vmem [shape: f32[2,4,128], index: 5, kind: output, shape index: {}]  }
   0x1   :  { %s1038_s20 = smov 0  }
   0x2 LB: > { %s27_s21 = sadd.s32 1, %s996_s19  ;;  %p779_p0 = scmp.ge.s32.totalorder %s1000_s20, 1  ;;  %s1000_s20 = sphi %s1038_s20, %s15_s20   ;;  %s996_s19 = sphi %s1036_s19, %s1230_s19   ;;  %s992_s18 = sphi %s1034_s18, %s1229_s18  }
   0x3   : > { %p29_p1 = scmp.ge.s32.totalorder %s27_s21, 2  ;;  %p217_p2 = scmp.lt.s32.totalorder %s1000_s20, 3 }
   0x5   : > { %s1232_s21 = smov (%p29_p1, %s27_s21), 0  ;;  %p218_p3 = pnand %p779_p0, %p217_p2 }
   0x6   : > { %p254_p4 = scmp.lt.s32.totalorder (!%p218_p3), %s992_s18, 1 }
   0x7   : > { %221 = sbr.rel (%p218_p3) target bundleno = 382 (0x17e), region = 40 }
   0xc   : > { %v921_v0 = vld [vmem:[%s1224_s1 + $0x38] sm:$0xff]  ;;  %v920_v4 = vld [vmem:[%s1224_s1 + $0x30] sm:$0xff]  ;;  %s1234_s18 = smov (!%p254_p4, %s992_s18), 1  ;;  %v919_v8 = vld [vmem:[%s1224_s1 + $0x28] sm:$0xff]  ;;  %v1002_v37 = vmov 0.0   ;;  %v1003_v62 = vmov 4.0  }
   0xd   : > { %v929_v1 = vld [vmem:[%s1224_s1 + $0x78] sm:$0xff]  ;;  %546 = vmatpush.bf16.msra.mxu0 %v921_v0  ;;  %v928_v5 = vld [vmem:[%s1224_s1 + $0x70] sm:$0xff]  ;;  %s913_s13 = sshll.u32 %s1234_s18, 3  ;;  %v927_v9 = vld [vmem:[%s1224_s1 + $0x68] sm:$0xff]  ;;  %277 = vst [vmem:[#allocation2] sm:$0xf] %v1002_v37  ;;  %974 = vrcp.f32 %v1003_v62 }
   0xe   : > { %v937_v2 = vld [vmem:[%s1224_s1 + $0xb8] sm:$0xff]  ;;  %559 = vmatpush.bf16.msra.mxu1 %v929_v1  ;;  %v936_v6 = vld [vmem:[%s1224_s1 + $0xb0] sm:$0xff]  ;;  %v935_v10 = vld [vmem:[%s1224_s1 + $0xa8] sm:$0xff]  ;;  %s261_s28 = scalar_lea.vmem %s1223_s0, %s913_s13  ;;  %vm609_vm0 = vcmask 1043456   ;;  %s782_s15 = sshll.u32 %s1234_s18, 2 }
   0xf   : > { %v945_v3 = vld [vmem:[%s1224_s1 + $0xf8] sm:$0xff]  ;;  %572 = vmatpush.bf16.msra.mxu2 %v937_v2  ;;  %v944_v7 = vld [vmem:[%s1224_s1 + $0xf0] sm:$0xff]  ;;  %v943_v11 = vld [vmem:[%s1224_s1 + $0xe8] sm:$0xff]  ;;  %s272_s24 = scalar_lea.vmem %s1228_s5, %s782_s15 }
  0x10   : > { %585 = vmatpush.bf16.msra.mxu3 %v945_v3  ;;  %v918_v12 = vld [vmem:[%s1224_s1 + $0x20] sm:$0xff]  ;;  %v917_v17 = vld [vmem:[%s1224_s1 + $0x18] sm:$0xff]  ;;  %v916_v21 = vld [vmem:[%s1224_s1 + $0x10] sm:$0xff] }
  0x11   : > { %547 = vmatpush.bf16.msra.mxu0 %v920_v4  ;;  %v926_v13 = vld [vmem:[%s1224_s1 + $0x60] sm:$0xff]  ;;  %v925_v18 = vld [vmem:[%s1224_s1 + $0x58] sm:$0xff]  ;;  %v924_v22 = vld [vmem:[%s1224_s1 + $0x50] sm:$0xff] }
  0x12   : > { %560 = vmatpush.bf16.msra.mxu1 %v928_v5  ;;  %v934_v14 = vld [vmem:[%s1224_s1 + $0xa0] sm:$0xff]  ;;  %v933_v19 = vld [vmem:[%s1224_s1 + $0x98] sm:$0xff]  ;;  %v932_v23 = vld [vmem:[%s1224_s1 + $0x90] sm:$0xff] }
  0x13   : > { %573 = vmatpush.bf16.msra.mxu2 %v936_v6  ;;  %v942_v15 = vld [vmem:[%s1224_s1 + $0xe0] sm:$0xff]  ;;  %v941_v20 = vld [vmem:[%s1224_s1 + $0xd8] sm:$0xff]  ;;  %v940_v24 = vld [vmem:[%s1224_s1 + $0xd0] sm:$0xff]  ;;  %v975_v2 = vpop.eup %974 }
  0x14   : > { %586 = vmatpush.bf16.msra.mxu3 %v944_v7  ;;  %v279_v16 = vld [vmem:[%s261_s28] sm:$0xff]  ;;  %v915_v25 = vld [vmem:[%s1224_s1 + $0x8] sm:$0xff]  ;;  %v665_v38 = vld [vmem:[%s1226_s3 + $0x78] sm:$0xff]  ;;  %v618_v6 = vmul.f32 4.0, %v975_v2  ;;  %vm622_vm1 = vweird.f32 %v975_v2 }
  0x15   : > { %548 = vmatpush.bf16.msra.mxu0 %v919_v8  ;;  %345 = vst [vmem:[#allocation1] ss:$4 sm:$0xff] %v279_v16  ;;  %v923_v26 = vld [vmem:[%s1224_s1 + $0x48] sm:$0xff]  ;;  %v914_v29 = vld [vmem:[%s1224_s1] sm:$0xff]  ;;  %v664_v39 = vld [vmem:[%s1226_s3 + $0x70] sm:$0xff] }
  0x16   : > { %561 = vmatpush.bf16.msra.mxu1 %v927_v9  ;;  %v931_v27 = vld [vmem:[%s1224_s1 + $0x88] sm:$0xff]  ;;  %v922_v30 = vld [vmem:[%s1224_s1 + $0x40] sm:$0xff]  ;;  %v661_v42 = vld [vmem:[%s1226_s3 + $0x58] sm:$0xff]  ;;  %v619_v9 = vsub.f32 1.0, %v618_v6 }
  0x17   : > { %574 = vmatpush.bf16.msra.mxu2 %v935_v10  ;;  %v939_v28 = vld [vmem:[%s1224_s1 + $0xc8] sm:$0xff]  ;;  %v930_v31 = vld [vmem:[%s1224_s1 + $0x80] sm:$0xff]  ;;  %v660_v43 = vld [vmem:[%s1226_s3 + $0x50] sm:$0xff] }
  0x18   : > { %587 = vmatpush.bf16.msra.mxu3 %v943_v11  ;;  %v938_v32 = vld [vmem:[%s1224_s1 + $0xc0] sm:$0xff]  ;;  %v663_v40 = vld [vmem:[%s1226_s3 + $0x68] sm:$0xff]  ;;  %v657_v46 = vld [vmem:[%s1226_s3 + $0x38] sm:$0xff] }
  0x19   : > { %549 = vmatpush.bf16.msra.mxu0 %v918_v12  ;;  %v662_v41 = vld [vmem:[%s1226_s3 + $0x60] sm:$0xff]  ;;  %v659_v44 = vld [vmem:[%s1226_s3 + $0x48] sm:$0xff]  ;;  %v656_v47 = vld [vmem:[%s1226_s3 + $0x30] sm:$0xff]  ;;  %v620_v12 = vmul.f32 %v975_v2, %v619_v9 }
  0x1a   : > { %562 = vmatpush.bf16.msra.mxu1 %v926_v13  ;;  %v658_v45 = vld [vmem:[%s1226_s3 + $0x40] sm:$0xff]  ;;  %v655_v50 = vld [vmem:[%s1226_s3 + $0x28] sm:$0xff]  ;;  %v653_v53 = vld [vmem:[%s1226_s3 + $0x18] sm:$0xff] }
  0x1b   : > { %575 = vmatpush.bf16.msra.mxu2 %v934_v14  ;;  %v654_v51 = vld [vmem:[%s1226_s3 + $0x20] sm:$0xff]  ;;  %v652_v56 = vld [vmem:[%s1226_s3 + $0x10] sm:$0xff]  ;;  %v278_v60 = vld [vmem:[#allocation2] sm:$0xf] }
  0x1c   : > { %588 = vmatpush.bf16.msra.mxu3 %v942_v15  ;;  %v346_v33 = vld.sshfl [vmem:[#allocation1] sm:$0xff pattern:$0x73625140]  ;;  %v347_v34 = vld.sshfl [vmem:[#allocation1 + $0x8] sm:$0xff pattern:$0x73625140]  ;;  %v621_v15 = vadd.f32 %v975_v2, %v620_v12 }
  0x1d   : > { %550 = vmatpush.bf16.msra.mxu0 %v917_v17  ;;  %v348_v35 = vld.sshfl [vmem:[#allocation1 + $0x10] sm:$0xff pattern:$0x73625140]  ;;  %v349_v36 = vld.sshfl [vmem:[#allocation1 + $0x18] sm:$0xff pattern:$0x73625140] }
  0x1e   : > { %563 = vmatpush.bf16.msra.mxu1 %v925_v18  ;;  %v651_v61 = vld [vmem:[%s1226_s3 + $0x8] sm:$0xff]  ;;  %v650_v0 = vld [vmem:[%s1226_s3] sm:$0xff]  ;;  %v623_v18 = vsel %vm622_vm1, %v975_v2, %v621_v15 }
  0x1f   : > { %576 = vmatpush.bf16.msra.mxu2 %v933_v19  ;;  %v972_v5 = vld [vmem:[%s1225_s2] ss:$0 sm:$0xff] }
  0x20   : > { %589 = vmatpush.bf16.msra.mxu3 %v941_v20 }
  0x21   : > { %551 = vmatpush.bf16.msra.mxu0 %v916_v21 }
  0x22   : > { %564 = vmatpush.bf16.msra.mxu1 %v924_v22 }
  0x23   : > { %577 = vmatpush.bf16.msra.mxu2 %v932_v23 }
  0x24   : > { %590 = vmatpush.bf16.msra.mxu3 %v940_v24 }
  0x25   : > { %552 = vmatpush.bf16.msra.mxu0 %v915_v25 }
  0x26   : > { %565 = vmatpush.bf16.msra.mxu1 %v923_v26 }
  0x27   : > { %578 = vmatpush.bf16.msra.mxu2 %v931_v27 }
  0x28   : > { %591 = vmatpush.bf16.msra.mxu3 %v939_v28 }
  0x29   : > { %553 = vmatpush.bf16.msra.mxu0 %v914_v29 }
  0x2a   : > { %566 = vmatpush.bf16.msra.mxu1 %v922_v30 }
  0x2b   : > { %579 = vmatpush.bf16.msra.mxu2 %v930_v31 }
  0x2c   : > { %592 = vmatpush.bf16.msra.mxu3 %v938_v32  ;;  %554 = vmatmul.bf16.vlgmr.msra.gmra.mxu0 %v346_v33 }
  0x2d   : > { %567 = vmatmul.bf16.vlgmr.msra.gmra.mxu1 %v347_v34  ;;  %670 = vmatpush.msrb.mxu0 %v665_v38 }
  0x2e   : > { %580 = vmatmul.bf16.vlgmr.msra.gmra.mxu2 %v348_v35 }
  0x2f   : > { %593 = vmatmul.bf16.vlgmr.msra.gmra.mxu3 %v349_v36  ;;  %671 = vmatpush.msrb.mxu0 %v664_v39 }
  0x31   : > { %672 = vmatpush.msrb.mxu0 %v663_v40 }
  0x33   : > { %673 = vmatpush.msrb.mxu0 %v662_v41 }
  0x35   : > { %674 = vmatpush.msrb.mxu0 %v661_v42  ;;  %v973_v42 = vld [vmem:[%s1227_s4] ss:$0 sm:$0xff] }
  0x37   : > { %675 = vmatpush.msrb.mxu0 %v660_v43 }
  0x39   : > { %676 = vmatpush.msrb.mxu0 %v659_v44 }
  0x3b   : > { %677 = vmatpush.msrb.mxu0 %v658_v45 }
  0x3d   : > { %678 = vmatpush.msrb.mxu0 %v657_v46 }
  0x3f   : > { %679 = vmatpush.msrb.mxu0 %v656_v47 }
  0x41   : > { %680 = vmatpush.msrb.mxu0 %v655_v50 }
  0x43   : > { %681 = vmatpush.msrb.mxu0 %v654_v51 }
  0x45   : > { %682 = vmatpush.msrb.mxu0 %v653_v53 }
  0x47   : > { %683 = vmatpush.msrb.mxu0 %v652_v56 }
  0x49   : > { %684 = vmatpush.msrb.mxu0 %v651_v61 }
  0x4b   : > { %685 = vmatpush.msrb.mxu0 %v650_v0 }
  0xa9   : > { %v555_v48 = vpop.f32.mrf.mxu0 }
  0xaa   : > { %v568_v49 = vpop.f32.mrf.mxu1 }
  0xab   : > { %v569_v52 = vadd.f32 %v568_v49, %v555_v48 }
  0xb1   : > { %v581_v54 = vpop.f32.mrf.mxu2  ;;  %v557_v58 = vpop.f32.mrf.mxu0 }
  0xb2   : > { %v594_v55 = vpop.f32.mrf.mxu3  ;;  %v582_v57 = vadd.f32 %v581_v54, %v569_v52  ;;  %v570_v59 = vpop.f32.mrf.mxu1 }
  0xb4   : > { %v595_v63 = vadd.f32 %v594_v55, %v582_v57 }
  0xb6   : > { %v598_v1 = vadd.f32 %v595_v63, %v278_v60 }
  0xb8   : > { %599 = vst [vmem:[#allocation2] sm:$0xf] %v598_v1 }
  0xb9   : > { %v583_v3 = vpop.f32.mrf.mxu2 }
  0xba   : > { %v596_v4 = vpop.f32.mrf.mxu3 }
  0xbf   : > { %v603_v7 = vld [vmem:[#allocation2] sm:$0xf] }
  0xc0   : > { %v608_v8 = vadd.f32 %v972_v5, %v603_v7 }
  0xc2   : > { %v610_v10 = vsel %vm609_vm0, %v608_v8, 0.0 }
  0xc3   : > { %v611_v11 = vrot.slane %v610_v10, 4 }
  0xc5   : > { %v612_v13 = vadd.f32 %v611_v11, %v610_v10 }
  0xc7   : > { %v613_v14 = vrot.slane %v612_v13, 2 }
  0xc9   : > { %v614_v16 = vadd.f32 %v613_v14, %v612_v13 }
  0xcb   : > { %v615_v17 = vrot.slane %v614_v16, 1 }
  0xcd   : > { %v616_v19 = vadd.f32 %v615_v17, %v614_v16 }
  0xcf   : > { %v624_v20 = vmul.f32 %v623_v18, %v616_v19 }
  0xd1   : > { %v625_v21 = vsub.f32 %v608_v8, %v624_v20 }
  0xd3   : > { %v626_v22 = vmul.f32 %v625_v21, %v625_v21 }
  0xd5   : > { %v627_v23 = vsel %vm609_vm0, %v626_v22, 0.0 }
  0xd6   : > { %v628_v24 = vrot.slane %v627_v23, 4 }
  0xd8   : > { %v629_v25 = vadd.f32 %v628_v24, %v627_v23 }
  0xda   : > { %v630_v26 = vrot.slane %v629_v25, 2 }
  0xdc   : > { %v631_v27 = vadd.f32 %v630_v26, %v629_v25 }
  0xde   : > { %v632_v28 = vrot.slane %v631_v27, 1 }
  0xe0   : > { %v633_v29 = vadd.f32 %v632_v28, %v631_v27 }
  0xe2   : > { %v634_v30 = vmul.f32 %v633_v29, %v623_v18 }
  0xe4   : > { %v635_v31 = vadd.f32 1e-05, %v634_v30 }
  0xe6   : > { %976 = vrsqrt.f32 %v635_v31  ;;  %vm642_vm3 = vweird.f32 %v635_v31 }
  0xec   : > { %v977_v32 = vpop.eup %976 }
  0xed   : > { %v637_v33 = vmul.f32 %v977_v32, %v635_v31  ;;  %vm643_vm2 = vweird.f32 %v977_v32 }
  0xee   : > { %vm644_vm4 = vmor %vm642_vm3, %vm643_vm2 }
  0xef   : > { %v638_v34 = vmul.f32 %v977_v32, %v637_v33 }
  0xf1   : > { %v639_v35 = vmul.f32 0.5, %v638_v34 }
  0xf3   : > { %v640_v36 = vsub.f32 1.5, %v639_v35 }
  0xf5   : > { %v641_v37 = vmul.f32 %v977_v32, %v640_v36 }
  0xf7   : > { %v645_v38 = vsel %vm644_vm4, %v977_v32, %v641_v37 }
  0xf8   : > { %v646_v39 = vmul.f32 %v645_v38, %v625_v21 }
  0xfa   : > { %vm647_vm5 = vcmp.gt.f32.partialorder %v646_v39, 0.0  ;;  %v648_v40 = vmul.f32 0.2, %v646_v39 }
  0xfc   : > { %v649_v41 = vsel %vm647_vm5, %v646_v39, %v648_v40 }
  0xfd   : > { %686 = vmatmul.f32.vlgmr.msrb.gmra.mxu0 %v649_v41 }
 0x17a   : > { %v687_v43 = vpop.f32.mrf.mxu0 }
 0x17b   : > { %v688_v44 = vadd.f32 %v973_v42, %v687_v43 }
 0x17d   : > { %690 = vst [vmem:[%s272_s24] sm:$0xf] %v688_v44 }
 0x17e PF: > { %s15_s20 = sadd.s32 1, %s1000_s20   ;;  %s1229_s18 = smov %s996_s19 }
 0x17f   : > { %p12_p5 = scmp.ge.s32.totalorder %s15_s20, 4   ;;  %s1230_s19 = smov %s1232_s21 }
 0x181   :  { %14 = sbr.rel (!%p12_p5) target bundleno = 2 (0x2), region = 81 }

</bundles_post_ra>
